<compile_context>
chip_gen: v7x
topology: tpu7x:2x2x1
jax: 0.10.0
libtpu: 0.0.40
codegen_flags: <defaults>
</compile_context>

<pallas_src>
import jax
import jax.numpy as jnp
from jax.experimental import pallas as pl
from jax.experimental.pallas import tpu as pltpu


def _round_up(x, m):
    return (x + m - 1) // m * m


def _mlp_kernel(x_ref, w1_ref, b1_ref, w2_ref, b2_ref,
                w3_ref, b3_ref, w4_ref, b4_ref, out_ref):
    # One batch tile per grid step; weights/biases are full-array VMEM-resident
    # blocks (same block index every step -> fetched once). Matmuls hit the MXU
    # (bf16 inputs, f32 accumulation), tanh runs on the EUP, bias adds on the
    # VPU — the whole hot path is fused in a single kernel.
    x = x_ref[...].astype(jnp.bfloat16)
    h = jnp.tanh(
        jnp.dot(x, w1_ref[...], preferred_element_type=jnp.float32) + b1_ref[...]
    ).astype(jnp.bfloat16)
    h = jnp.tanh(
        jnp.dot(h, w2_ref[...], preferred_element_type=jnp.float32) + b2_ref[...]
    ).astype(jnp.bfloat16)
    h = jnp.tanh(
        jnp.dot(h, w3_ref[...], preferred_element_type=jnp.float32) + b3_ref[...]
    ).astype(jnp.bfloat16)
    out = jnp.dot(h, w4_ref[...], preferred_element_type=jnp.float32) + b4_ref[...]
    out_ref[...] = out.astype(out_ref.dtype)


def mlp_forward(x_nchw, params, num_classes, *, tb=256):
    """Forward pass matching the PyTorch Model.

    x_nchw: (B, C, H, W) float32.
    params: dict with w{i}: (in, out) f32 (transposed from PyTorch's (out, in)),
            b{i}: (1, out) f32.
    """
    B = x_nchw.shape[0]
    x = x_nchw.reshape(B, -1)                       # nn.Flatten (row-major, free)
    D = x.shape[1]

    # --- operand prep (plain JAX; weight transforms are constant-foldable) ---
    # Weights in bf16 (native MXU dtype, half the HBM bytes); biases stay f32
    # and are added after the f32-accumulated dot.
    w1 = params["w1"].astype(jnp.bfloat16)
    w2 = params["w2"].astype(jnp.bfloat16)
    w3 = params["w3"].astype(jnp.bfloat16)
    b1, b2, b3 = params["b1"], params["b2"], params["b3"]

    # Lane-align the contraction dim of the first layer if needed (zeros in the
    # padded K slots contribute nothing). No-op for D % 128 == 0 (e.g. 48*48).
    Dp = _round_up(D, 128)
    if Dp != D:
        x = jnp.pad(x, ((0, 0), (0, Dp - D)))
        w1 = jnp.pad(w1, ((0, Dp - D), (0, 0)))

    # Pad the last layer to a lane-dense multiple of 128 output columns
    # (unmasked vst on the output slab; sliced back in the wrapper).
    NP = _round_up(num_classes, 128)
    w4 = jnp.zeros((params["w4"].shape[0], NP), jnp.bfloat16)
    w4 = w4.at[:, :num_classes].set(params["w4"].astype(jnp.bfloat16))
    b4 = jnp.zeros((1, NP), jnp.float32).at[:, :num_classes].set(params["b4"])

    # Tile the batch axis; pad B up to a multiple of the tile (sublane-aligned).
    TB = min(tb, _round_up(B, 8))
    Bp = _round_up(B, TB)
    if Bp != B:
        x = jnp.pad(x, ((0, Bp - B), (0, 0)))
    nb = Bp // TB

    def batch_tile(i):          # activations / output: indexed by batch grid axis
        return (i, 0)

    def resident(i):            # weights / biases: same block every step (VMEM-resident)
        return (0, 0)

    out = pl.pallas_call(
        _mlp_kernel,
        out_shape=jax.ShapeDtypeStruct((Bp, NP), jnp.float32),
        grid=(nb,),
        in_specs=[
            pl.BlockSpec((TB, Dp), batch_tile),
            pl.BlockSpec(w1.shape, resident),
            pl.BlockSpec(b1.shape, resident),
            pl.BlockSpec(w2.shape, resident),
            pl.BlockSpec(b2.shape, resident),
            pl.BlockSpec(w3.shape, resident),
            pl.BlockSpec(b3.shape, resident),
            pl.BlockSpec(w4.shape, resident),
            pl.BlockSpec(b4.shape, resident),
        ],
        out_specs=pl.BlockSpec((TB, NP), batch_tile),
        compiler_params=pltpu.CompilerParams(
            # Batch axis is embarrassingly parallel -> pipelining + megacore.
            dimension_semantics=("parallel",),
        ),
    )(x, w1, b1, w2, b2, w3, b3, w4, b4)

    return out[:B, :num_classes]


def init_params(key, input_dims, num_classes):
    """Deterministic init mimicking PyTorch nn.Linear default (U[-1/sqrt(fan_in), ..]).
    Weights stored transposed: (in, out); biases as (1, out) for broadcast."""
    dims = [(input_dims, 1024), (1024, 512), (512, 256), (256, num_classes)]
    params = {}
    for i, (fan_in, fan_out) in enumerate(dims, start=1):
        key, kw, kb = jax.random.split(key, 3)
        bound = 1.0 / jnp.sqrt(jnp.float32(fan_in))
        params[f"w{i}"] = jax.random.uniform(
            kw, (fan_in, fan_out), jnp.float32, -bound, bound)
        params[f"b{i}"] = jax.random.uniform(
            kb, (1, fan_out), jnp.float32, -bound, bound)
    return params


def reference_forward(x_nchw, params):
    x = x_nchw.reshape(x_nchw.shape[0], -1)
    h = jnp.tanh(x @ params["w1"] + params["b1"])
    h = jnp.tanh(h @ params["w2"] + params["b2"])
    h = jnp.tanh(h @ params["w3"] + params["b3"])
    return h @ params["w4"] + params["b4"]


if __name__ == "__main__":
    key = jax.random.PRNGKey(0)
    B, C, H, W = 32, 1, 16, 16           # small FER-style grayscale input
    input_dims = C * H * W               # 256
    num_classes = 7

    kx, kp = jax.random.split(key)
    x = jax.random.normal(kx, (B, C, H, W), jnp.float32)
    params = init_params(kp, input_dims, num_classes)

    # tb=8 -> 4 batch tiles: exercises the grid / pipelined path at small B.
    out = mlp_forward(x, params, num_classes, tb=8)
    out = jax.block_until_ready(out)

    ref = reference_forward(x, params)
    assert out.shape == (B, num_classes)
    # Kernel uses bf16 weights/activations (f32 accumulation) vs an f32
    # reference, so the tolerance is loosened accordingly.
    assert jnp.allclose(out, ref, atol=3e-2, rtol=3e-2), "mismatch vs reference"

    print("KERNEL_OK")
</pallas_src>

<mosaic_0001>
module attributes {stable_mosaic.version = 11 : i64} {
  func.func @_mlp_kernel(%arg0: i32, %arg1: memref<8x256xf32, #tpu.memory_space<vmem>>, %arg2: memref<256x1024xbf16, #tpu.memory_space<vmem>>, %arg3: memref<1x1024xf32, #tpu.memory_space<vmem>>, %arg4: memref<1024x512xbf16, #tpu.memory_space<vmem>>, %arg5: memref<1x512xf32, #tpu.memory_space<vmem>>, %arg6: memref<512x256xbf16, #tpu.memory_space<vmem>>, %arg7: memref<1x256xf32, #tpu.memory_space<vmem>>, %arg8: memref<256x128xbf16, #tpu.memory_space<vmem>>, %arg9: memref<1x128xf32, #tpu.memory_space<vmem>>, %arg10: memref<8x128xf32, #tpu.memory_space<vmem>>) attributes {dimension_semantics = [#tpu.dimension_semantics<parallel>], iteration_bounds = array<i64: 4>, scalar_prefetch = 0 : i64, scratch_operands = 0 : i64, tpu.core_type = #tpu.core_type<tc>, window_params = [{transform_indices = @transform_0, window_bounds = array<i64: 8, 256>}, {pipeline_mode = #tpu.pipeline_mode<synchronous>, transform_indices = @transform_1, window_bounds = array<i64: 256, 1024>}, {pipeline_mode = #tpu.pipeline_mode<synchronous>, transform_indices = @transform_2, window_bounds = array<i64: 1, 1024>}, {pipeline_mode = #tpu.pipeline_mode<synchronous>, transform_indices = @transform_3, window_bounds = array<i64: 1024, 512>}, {pipeline_mode = #tpu.pipeline_mode<synchronous>, transform_indices = @transform_4, window_bounds = array<i64: 1, 512>}, {pipeline_mode = #tpu.pipeline_mode<synchronous>, transform_indices = @transform_5, window_bounds = array<i64: 512, 256>}, {pipeline_mode = #tpu.pipeline_mode<synchronous>, transform_indices = @transform_6, window_bounds = array<i64: 1, 256>}, {pipeline_mode = #tpu.pipeline_mode<synchronous>, transform_indices = @transform_7, window_bounds = array<i64: 256, 128>}, {pipeline_mode = #tpu.pipeline_mode<synchronous>, transform_indices = @transform_8, window_bounds = array<i64: 1, 128>}, {transform_indices = @transform_9, window_bounds = array<i64: 8, 128>}]} {
    %c0 = arith.constant 0 : index
    %c0_0 = arith.constant 0 : index
    %0 = vector.load %arg1[%c0, %c0_0] : memref<8x256xf32, #tpu.memory_space<vmem>>, vector<8x256xf32>
    %1 = arith.truncf %0 : vector<8x256xf32> to vector<8x256xbf16>
    %c0_1 = arith.constant 0 : index
    %c0_2 = arith.constant 0 : index
    %2 = vector.load %arg2[%c0_1, %c0_2] : memref<256x1024xbf16, #tpu.memory_space<vmem>>, vector<256x1024xbf16>
    %cst = arith.constant dense<0.000000e+00> : vector<8x1024xf32>
    %3 = tpu.matmul %1, %2, %cst {dimension_numbers = #tpu.dot_dimension_numbers<[1], [0], [0], [1], [0, 0, 1, 1], [], []>} : vector<8x256xbf16>, vector<256x1024xbf16>, vector<8x1024xf32> -> vector<8x1024xf32>
    %c0_3 = arith.constant 0 : index
    %c0_4 = arith.constant 0 : index
    %4 = vector.load %arg3[%c0_3, %c0_4] : memref<1x1024xf32, #tpu.memory_space<vmem>>, vector<1x1024xf32>
    %5 = vector.broadcast %4 : vector<1x1024xf32> to vector<8x1024xf32>
    %6 = arith.addf %3, %5 : vector<8x1024xf32>
    %7 = math.tanh %6 : vector<8x1024xf32>
    %8 = arith.truncf %7 : vector<8x1024xf32> to vector<8x1024xbf16>
    %c0_5 = arith.constant 0 : index
    %c0_6 = arith.constant 0 : index
    %9 = vector.load %arg4[%c0_5, %c0_6] : memref<1024x512xbf16, #tpu.memory_space<vmem>>, vector<1024x512xbf16>
    %cst_7 = arith.constant dense<0.000000e+00> : vector<8x512xf32>
    %10 = tpu.matmul %8, %9, %cst_7 {dimension_numbers = #tpu.dot_dimension_numbers<[1], [0], [0], [1], [0, 0, 1, 1], [], []>} : vector<8x1024xbf16>, vector<1024x512xbf16>, vector<8x512xf32> -> vector<8x512xf32>
    %c0_8 = arith.constant 0 : index
    %c0_9 = arith.constant 0 : index
    %11 = vector.load %arg5[%c0_8, %c0_9] : memref<1x512xf32, #tpu.memory_space<vmem>>, vector<1x512xf32>
    %12 = vector.broadcast %11 : vector<1x512xf32> to vector<8x512xf32>
    %13 = arith.addf %10, %12 : vector<8x512xf32>
    %14 = math.tanh %13 : vector<8x512xf32>
    %15 = arith.truncf %14 : vector<8x512xf32> to vector<8x512xbf16>
    %c0_10 = arith.constant 0 : index
    %c0_11 = arith.constant 0 : index
    %16 = vector.load %arg6[%c0_10, %c0_11] : memref<512x256xbf16, #tpu.memory_space<vmem>>, vector<512x256xbf16>
    %cst_12 = arith.constant dense<0.000000e+00> : vector<8x256xf32>
    %17 = tpu.matmul %15, %16, %cst_12 {dimension_numbers = #tpu.dot_dimension_numbers<[1], [0], [0], [1], [0, 0, 1, 1], [], []>} : vector<8x512xbf16>, vector<512x256xbf16>, vector<8x256xf32> -> vector<8x256xf32>
    %c0_13 = arith.constant 0 : index
    %c0_14 = arith.constant 0 : index
    %18 = vector.load %arg7[%c0_13, %c0_14] : memref<1x256xf32, #tpu.memory_space<vmem>>, vector<1x256xf32>
    %19 = vector.broadcast %18 : vector<1x256xf32> to vector<8x256xf32>
    %20 = arith.addf %17, %19 : vector<8x256xf32>
    %21 = math.tanh %20 : vector<8x256xf32>
    %22 = arith.truncf %21 : vector<8x256xf32> to vector<8x256xbf16>
    %c0_15 = arith.constant 0 : index
    %c0_16 = arith.constant 0 : index
    %23 = vector.load %arg8[%c0_15, %c0_16] : memref<256x128xbf16, #tpu.memory_space<vmem>>, vector<256x128xbf16>
    %cst_17 = arith.constant dense<0.000000e+00> : vector<8x128xf32>
    %24 = tpu.matmul %22, %23, %cst_17 {dimension_numbers = #tpu.dot_dimension_numbers<[1], [0], [0], [1], [0, 0, 1, 1], [], []>} : vector<8x256xbf16>, vector<256x128xbf16>, vector<8x128xf32> -> vector<8x128xf32>
    %c0_18 = arith.constant 0 : index
    %c0_19 = arith.constant 0 : index
    %25 = vector.load %arg9[%c0_18, %c0_19] : memref<1x128xf32, #tpu.memory_space<vmem>>, vector<1x128xf32>
    %26 = vector.broadcast %25 : vector<1x128xf32> to vector<8x128xf32>
    %27 = arith.addf %24, %26 : vector<8x128xf32>
    %c0_20 = arith.constant 0 : index
    %c0_21 = arith.constant 0 : index
    %28 = vector.load %arg10[%c0_20, %c0_21] : memref<8x128xf32, #tpu.memory_space<vmem>>, vector<8x128xf32>
    tpu.vector_store %arg10[%c0_20, %c0_21], %27 {strides = array<i32>} : memref<8x128xf32, #tpu.memory_space<vmem>>, vector<8x128xf32>,
    return
  }
  func.func @transform_0(%arg0: i32) -> (i32, i32) {
    %c0_i32 = arith.constant 0 : i32
    %c0_i32_0 = arith.constant 0 : i32
    return %arg0, %c0_i32 : i32, i32
  }
  func.func @transform_1(%arg0: i32) -> (i32, i32) {
    %c0_i32 = arith.constant 0 : i32
    %c0_i32_0 = arith.constant 0 : i32
    %c0_i32_1 = arith.constant 0 : i32
    return %c0_i32, %c0_i32_0 : i32, i32
  }
  func.func @transform_2(%arg0: i32) -> (i32, i32) {
    %c0_i32 = arith.constant 0 : i32
    %c0_i32_0 = arith.constant 0 : i32
    %c0_i32_1 = arith.constant 0 : i32
    return %c0_i32, %c0_i32_0 : i32, i32
  }
  func.func @transform_3(%arg0: i32) -> (i32, i32) {
    %c0_i32 = arith.constant 0 : i32
    %c0_i32_0 = arith.constant 0 : i32
    %c0_i32_1 = arith.constant 0 : i32
    return %c0_i32, %c0_i32_0 : i32, i32
  }
  func.func @transform_4(%arg0: i32) -> (i32, i32) {
    %c0_i32 = arith.constant 0 : i32
    %c0_i32_0 = arith.constant 0 : i32
    %c0_i32_1 = arith.constant 0 : i32
    return %c0_i32, %c0_i32_0 : i32, i32
  }
  func.func @transform_5(%arg0: i32) -> (i32, i32) {
    %c0_i32 = arith.constant 0 : i32
    %c0_i32_0 = arith.constant 0 : i32
    %c0_i32_1 = arith.constant 0 : i32
    return %c0_i32, %c0_i32_0 : i32, i32
  }
  func.func @transform_6(%arg0: i32) -> (i32, i32) {
    %c0_i32 = arith.constant 0 : i32
    %c0_i32_0 = arith.constant 0 : i32
    %c0_i32_1 = arith.constant 0 : i32
    return %c0_i32, %c0_i32_0 : i32, i32
  }
  func.func @transform_7(%arg0: i32) -> (i32, i32) {
    %c0_i32 = arith.constant 0 : i32
    %c0_i32_0 = arith.constant 0 : i32
    %c0_i32_1 = arith.constant 0 : i32
    return %c0_i32, %c0_i32_0 : i32, i32
  }
  func.func @transform_8(%arg0: i32) -> (i32, i32) {
    %c0_i32 = arith.constant 0 : i32
    %c0_i32_0 = arith.constant 0 : i32
    %c0_i32_1 = arith.constant 0 : i32
    return %c0_i32, %c0_i32_0 : i32, i32
  }
  func.func @transform_9(%arg0: i32) -> (i32, i32) {
    %c0_i32 = arith.constant 0 : i32
    %c0_i32_0 = arith.constant 0 : i32
    return %arg0, %c0_i32 : i32, i32
  }
}

</mosaic_0001>

<bundles_post_ra>
// kernel: tpu_custom_call.1
= control target key start
LH: loop header
LB: loop body
LE: loop exit
PB: predicated region body
PF: predicated region fallthrough
CT: control target
= control target key end

     0   :  { %s5960_s0 = inlined_call_operand.hbm [shape: f32[32,256], index: 0, kind: input, shape index: {}]   ;;  %s5961_s1 = inlined_call_operand.hbm [shape: bf16[256,1024], index: 1, kind: input, shape index: {}]   ;;  %s5962_s2 = inlined_call_operand.hbm [shape: f32[1,1024], index: 2, kind: input, shape index: {}]   ;;  %s5963_s3 = inlined_call_operand.hbm [shape: bf16[1024,512], index: 3, kind: input, shape index: {}]   ;;  %s5964_s4 = inlined_call_operand.vmem [shape: f32[1,512], index: 4, kind: input, shape index: {}]   ;;  %s5965_s5 = inlined_call_operand.hbm [shape: bf16[512,256], index: 5, kind: input, shape index: {}]   ;;  %s5966_s6 = inlined_call_operand.vmem [shape: f32[1,256], index: 6, kind: input, shape index: {}]   ;;  %s5967_s7 = inlined_call_operand.hbm [shape: bf16[256,128], index: 7, kind: input, shape index: {}]   ;;  %s5968_s8 = inlined_call_operand.vmem [shape: f32[1,128], index: 8, kind: input, shape index: {}]   ;;  %s5969_s9 = inlined_call_operand.hbm [shape: f32[32,128], index: 9, kind: output, shape index: {}]  }
   0x1   :  { %5974 = sst [smem:[#allocation19_spill]] %s5969_s9 }
   0x2   :  { %14 = vsyncpa [#allocation3], 0 }
   0x3   :  { %16 = vsyncpa [#allocation3 + $0x1], 0 }
   0x4   :  { %17 = vsyncpa [#allocation6], 0 }
   0x5   :  { %18 = vsyncpa [#allocation9], 0 }
   0x6   :  { %19 = vsyncpa [#allocation12], 0 }
   0x7   :  { %20 = vsyncpa [#allocation4], 0 }
   0x8   :  { %22 = vsyncpa [#allocation4 + $0x1], 0  ;;  %s5588_s30 = smov 0   ;;  %s5590_s10 = smov 0  }
   0x9   :  { %s5592_s11 = smov 0   ;;  %s5594_s12 = smov 0  }
   0xa LB: > { %s5523_s13 = smov [#allocation5]   ;;  %s5609_s15 = sadd.s32 4294967295, %s5521_s12   ;;  %s5521_s12 = sphi %s5594_s12, %s5996_s12   ;;  %s5517_s11 = sphi %s5592_s11, %s5995_s11   ;;  %s5513_s10 = sphi %s5590_s10, %s5994_s10   ;;  %s5509_s30 = sphi %s5588_s30, %s5993_s30  }
   0xb   : > { %s265_s14 = sshll.u32 %s5523_s13, 4  ;;  %p4100_p0 = scmp.ge.s32.totalorder %s5521_s12, 1  ;;  %s5614_s14 = int_to_ptr.vmem [resolvable:$true] %s265_s14 }
   0xc   : > { %p5971_p1 = scmp.eq.s32.totalorder %s5609_s15, 0  ;;  %p253_p2 = scmp.lt.s32.totalorder %s5521_s12, 5 }
   0xd   : > { %s5524_s17 = smov [#allocation8]   ;;  %s5525_s20 = smov [#allocation7]  }
   0xe   : > { %p5616_p3 = pnand %p4100_p0, %p253_p2  ;;  %s289_s18 = sshll.u32 %s5524_s17, 4  ;;  %s5628_s18 = int_to_ptr.vmem [resolvable:$true] %s289_s18 }
   0xf   : > { %s5630_s21 = sshll.u32 %s5525_s20, 4  ;;  %s5273_s24 = scalar_lea.hbm %s5961_s1, 16384  ;;  %s280_s21 = int_to_ptr.vmem [resolvable:$true] %s5630_s21 }
  0x10   : > { %s5975_s16 = scalar_select %p5616_p3, 1, 0 }
  0x11   : > { %p4668_p4 = pneg %p5616_p3  ;;  %p5274_p6 = scmp.ne.s32.totalorder %s5961_s1, %s5273_s24 }
  0x12   : > { %p5280_p10 = scmp.lt.u32.totalorder %s5273_s24, %s5961_s1 }
  0x13   : > { %p5624_p5 = pnand %p4668_p4, %p5971_p1 }
  0x15   : > { %p5640_p7 = pneg %p5624_p5 }
  0x17   : > { %p5276_p8 = pnand %p5640_p7, %p5274_p6 }
  0x19   : > { %p5277_p9 = pneg %p5276_p8 }
  0x1b   : > { %p5282_p11 = pnand %p5280_p10, %p5277_p9 }
  0x1d   : > { %5285 = shalt.err (!%p5282_p11)
}
  0x1e   : > { %s5286_s13 = scalar_lea.vmem %s5614_s14, 16384  ;;  %p5294_p2 = scmp.lt.s32.totalorder %s5614_s14, %s5614_s14 }
  0x1f   : > { %p5287_p12 = scmp.ne.s32.totalorder %s5614_s14, %s5286_s13  ;;  %p5295_p4 = scmp.lt.s32.totalorder %s5286_s13, %s5286_s13 }
  0x21   : > { %p5289_p13 = pnand %p5287_p12, %p5640_p7  ;;  %p5296_p6 = por %p5295_p4, %p5294_p2 }
  0x23   : > { %p5290_p0 = pneg %p5289_p13 }
  0x25   : > { %p5297_p8 = pnand %p5296_p6, %p5290_p0 }
  0x27   : > { %5300 = shalt.err (!%p5297_p8)
}
  0x28   : > { %s5526_s17 = smov 512   ;;  %s5527_s20 = smov 32  }
  0x29   : > { %4671 = dma.hbm_to_vmem [thread:$0]  (!%p5624_p5), %s5961_s1, 16384, %s5614_s14, [#allocation6], %s5526_s17, %s5526_s17, %s5527_s20  }
  0x2a   : > { %s5301_s26 = scalar_lea.hbm %s5963_s3, 32768 }
  0x2b   : > { %p5302_p9 = scmp.ne.s32.totalorder %s5963_s3, %s5301_s26  ;;  %p5308_p12 = scmp.lt.u32.totalorder %s5301_s26, %s5963_s3 }
  0x2d   : > { %p5304_p10 = pnand %p5302_p9, %p5640_p7 }
  0x2f   : > { %p5305_p11 = pneg %p5304_p10 }
  0x31   : > { %p5310_p13 = pnand %p5308_p12, %p5305_p11 }
  0x33   : > { %5313 = shalt.err (!%p5310_p13)
}
  0x34   : > { %s5314_s14 = scalar_lea.vmem %s5628_s18, 32768  ;;  %p5322_p6 = scmp.lt.s32.totalorder %s5628_s18, %s5628_s18 }
  0x35   : > { %p5315_p0 = scmp.ne.s32.totalorder %s5628_s18, %s5314_s14  ;;  %p5323_p8 = scmp.lt.s32.totalorder %s5314_s14, %s5314_s14 }
  0x37   : > { %p5317_p2 = pnand %p5315_p0, %p5640_p7  ;;  %p5324_p9 = por %p5323_p8, %p5322_p6 }
  0x39   : > { %p5318_p4 = pneg %p5317_p2 }
  0x3b   : > { %p5325_p10 = pnand %p5324_p9, %p5318_p4 }
  0x3d   : > { %5328 = shalt.err (!%p5325_p10)
}
  0x3e   : > { %s5528_s17 = smov 256   ;;  %s5529_s9 = smov 16  }
  0x3f   : > { %4677 = dma.hbm_to_vmem [thread:$0]  (!%p5624_p5), %s5963_s3, 32768, %s5628_s18, [#allocation9], %s5528_s17, %s5528_s17, %s5529_s9  }
  0x40   : > { %s5329_s25 = scalar_lea.hbm %s5962_s2, 128 }
  0x41   : > { %p5330_p11 = scmp.ne.s32.totalorder %s5962_s2, %s5329_s25  ;;  %p5336_p0 = scmp.lt.u32.totalorder %s5329_s25, %s5962_s2 }
  0x43   : > { %p5332_p12 = pnand %p5330_p11, %p5640_p7 }
  0x45   : > { %p5333_p13 = pneg %p5332_p12 }
  0x47   : > { %p5338_p2 = pnand %p5336_p0, %p5333_p13 }
  0x49   : > { %5341 = shalt.err (!%p5338_p2)
}
  0x4a   : > { %s5342_s14 = scalar_lea.vmem %s280_s21, 128  ;;  %p5350_p9 = scmp.lt.s32.totalorder %s280_s21, %s280_s21 }
  0x4b   : > { %p5343_p4 = scmp.ne.s32.totalorder %s280_s21, %s5342_s14  ;;  %p5351_p10 = scmp.lt.s32.totalorder %s5342_s14, %s5342_s14 }
  0x4d   : > { %p5345_p6 = pnand %p5343_p4, %p5640_p7  ;;  %p5352_p1 = por %p5351_p10, %p5350_p9 }
  0x4f   : > { %p5346_p8 = pneg %p5345_p6 }
  0x51   : > { %p5353_p3 = pnand %p5352_p1, %p5346_p8 }
  0x53   : > { %5356 = shalt.err (!%p5353_p3)
}
  0x54   : > { %4674 = dma.hbm_to_vmem [thread:$0]  (!%p5624_p5), %s5962_s2, 128, %s280_s21, [#allocation6]  }
  0x55   : > { %s5530_s9 = smov [#allocation10]   ;;  %s5357_s24 = scalar_lea.hbm %s5965_s5, 8192 }
  0x56   : > { %s305_s20 = sshll.u32 %s5530_s9, 4  ;;  %p5358_p11 = scmp.ne.s32.totalorder %s5965_s5, %s5357_s24  ;;  %s306_s20 = int_to_ptr.vmem [resolvable:$true] %s305_s20 }
  0x57   : > { %p5364_p12 = scmp.lt.u32.totalorder %s5357_s24, %s5965_s5 }
  0x58   : > { %p5360_p1 = pnand %p5358_p11, %p5640_p7 }
  0x5a   : > { %p5361_p3 = pneg %p5360_p1 }
  0x5c   : > { %p5366_p13 = pnand %p5364_p12, %p5361_p3 }
  0x5e   : > { %5369 = shalt.err (!%p5366_p13)
}
  0x5f   : > { %s5370_s21 = scalar_lea.vmem %s306_s20, 8192  ;;  %p5378_p6 = scmp.lt.s32.totalorder %s306_s20, %s306_s20 }
  0x60   : > { %p5371_p0 = scmp.ne.s32.totalorder %s306_s20, %s5370_s21  ;;  %p5379_p8 = scmp.lt.s32.totalorder %s5370_s21, %s5370_s21 }
  0x62   : > { %p5373_p2 = pnand %p5371_p0, %p5640_p7  ;;  %p5380_p9 = por %p5379_p8, %p5378_p6 }
  0x64   : > { %p5374_p4 = pneg %p5373_p2 }
  0x66   : > { %p5381_p10 = pnand %p5380_p9, %p5374_p4 }
  0x68   : > { %5384 = shalt.err (!%p5381_p10)
}
  0x69   : > { %s5531_s13 = smov 128   ;;  %s5532_s14 = smov 8  }
  0x6a   : > { %4680 = dma.hbm_to_vmem [thread:$0]  (!%p5624_p5), %s5965_s5, 8192, %s306_s20, [#allocation9], %s5531_s13, %s5531_s13, %s5532_s14  }
  0x6b   : > { %s5533_s9 = smov [#allocation11]   ;;  %s5385_s25 = scalar_lea.hbm %s5967_s7, 2048 }
  0x6c   : > { %s321_s22 = sshll.u32 %s5533_s9, 4  ;;  %p5386_p11 = scmp.ne.s32.totalorder %s5967_s7, %s5385_s25  ;;  %s322_s22 = int_to_ptr.vmem [resolvable:$true] %s321_s22 }
  0x6d   : > { %p5392_p12 = scmp.lt.u32.totalorder %s5385_s25, %s5967_s7 }
  0x6e   : > { %p5388_p1 = pnand %p5386_p11, %p5640_p7 }
  0x70   : > { %p5389_p3 = pneg %p5388_p1 }
  0x72   : > { %p5394_p13 = pnand %p5392_p12, %p5389_p3 }
  0x74   : > { %5397 = shalt.err (!%p5394_p13)
}
  0x75   : > { %s5398_s20 = scalar_lea.vmem %s322_s22, 2048  ;;  %p5406_p6 = scmp.lt.s32.totalorder %s322_s22, %s322_s22 }
  0x76   : > { %p5399_p0 = scmp.ne.s32.totalorder %s322_s22, %s5398_s20  ;;  %p5407_p8 = scmp.lt.s32.totalorder %s5398_s20, %s5398_s20 }
  0x78   : > { %p5401_p2 = pnand %p5399_p0, %p5640_p7  ;;  %p5408_p9 = por %p5407_p8, %p5406_p6 }
  0x7a   : > { %p5402_p4 = pneg %p5401_p2 }
  0x7c   : > { %p5409_p10 = pnand %p5408_p9, %p5402_p4 }
  0x7e   : > { %5412 = shalt.err (!%p5409_p10)
}
  0x7f   : > { %s5534_s13 = smov 64   ;;  %s5535_s27 = smov 4  }
  0x80   : > { %4683 = dma.hbm_to_vmem [thread:$0]  (!%p5624_p5), %s5967_s7, 2048, %s322_s22, [#allocation12], %s5534_s13, %s5534_s13, %s5535_s27  }
  0x81   : > { %s4099_s17 = sadd.s32 4294967294, %s5521_s12   ;;  %s5741_s9 = sadd.s32 1, %s5521_s12  }
  0x82   : > { %s35_s23 = sadd.s32 1, %s5517_s11  ;;  %s32_s24 = ssub.s32 %s5521_s12, %s5741_s9 }
  0x83   : > { %p42_p7 = scmp.ne.s32.totalorder %s5517_s11, %s5513_s10  ;;  %p33_p11 = scmp.eq.s32.totalorder %s32_s24, 0 }
  0x84   : > { %p43_p1 = scmp.eq.s32.totalorder %s5521_s12, 0  ;;  %p48_p3 = scmp.ne.s32.totalorder %s5513_s10, %s5509_s30 }
  0x85   : > { %p240_p12 = scmp.eq.s32.totalorder %s5609_s15, 3  ;;  %p5978_p0 = scmp.eq.s32.totalorder %s5609_s15, 0 }
  0x86   : > { %s5753_s25 = scalar_select %p33_p11, %s5517_s11, %s35_s23  }
  0x87   : > { %p44_p13 = por %p43_p1, %p42_p7  ;;  %p5757_p2 = por %p5978_p0, %p48_p3 }
  0x88   : > { %p5761_p5 = por %p240_p12, %p42_p7  ;;  %p246_p4 = scmp.eq.s32.totalorder %s4099_s17, 3 }
  0x89   : > { %p4697_p6 = scmp.lt.s32.totalorder %s5521_s12, 4  ;;  %s338_s26 = sand.u32 1, %s5517_s11  }
  0x8a   : > { %s5980_s22 = scalar_select %p5761_p5, 1, 0 }
  0x8b   : > { %p5767_p8 = por %p246_p4, %p48_p3  ;;  %s4107_s29 = sshll.u32 %s338_s26, 4 }
  0x8c   : > { %s4587_s21 = sshll.u32 %s5521_s12, 8  ;;  %s342_s14 = scalar_lea.vmem [#allocation2], %s4107_s29 }
  0x8d   : > { %s5981_s28 = scalar_select %p5767_p8, 1, 0 }
  0x8e   : > { %s5775_s27 = scalar_lea.hbm %s5960_s0, %s4587_s21  ;;  %s350_s18 = sshll.u32 %s342_s14, 4  ;;  %s5781_s18 = int_to_ptr.vmem [resolvable:$true] %s350_s18 }
  0x8f   : > { %p5777_p9 = pnand %p4697_p6, %p44_p13  ;;  %s339_s23 = scalar_lea.sflag [#allocation3], %s338_s26 }
  0x90   : > { %s5413_s24 = scalar_lea.hbm %s5775_s27, 256  ;;  %s5418_s20 = scalar_lea.hbm %s5960_s0, 1024 }
  0x91   : > { %p5414_p10 = scmp.ne.s32.totalorder %s5775_s27, %s5413_s24  ;;  %p5415_p7 = pneg %p5777_p9 }
  0x92   : > { %p5419_p3 = scmp.lt.u32.totalorder %s5775_s27, %s5960_s0  ;;  %p5420_p12 = scmp.lt.u32.totalorder %s5418_s20, %s5413_s24 }
  0x93   : > { %p5416_p11 = pnand %p5415_p7, %p5414_p10  ;;  %p5422_p0 = scmp.lt.u32.totalorder %s5413_s24, %s5775_s27 }
  0x94   : > { %p5421_p13 = por %p5420_p12, %p5419_p3 }
  0x95   : > { %p5417_p1 = pneg %p5416_p11 }
  0x96   : > { %p5423_p4 = por %p5422_p0, %p5421_p13 }
  0x98   : > { %p5424_p6 = pnand %p5423_p4, %p5417_p1 }
  0x9a   : > { %5427 = shalt.err (!%p5424_p6)
}
  0x9b   : > { %s5428_s26 = scalar_lea.vmem %s5781_s18, 256  ;;  %s5536_s21 = smov [#allocation2]  }
  0x9c   : > { %p5429_p10 = scmp.ne.s32.totalorder %s5781_s18, %s5428_s26  ;;  %s5433_s29 = sshll.u32 %s5536_s21, 4  ;;  %s5434_s29 = int_to_ptr.vmem [resolvable:$false] %s5433_s29 }
  0x9d   : > { %s5435_s13 = scalar_lea.vmem %s5434_s29, 512  ;;  %p5436_p5 = scmp.lt.s32.totalorder %s5781_s18, %s5434_s29 }
  0x9e   : > { %p5431_p11 = pnand %p5429_p10, %p5415_p7  ;;  %p5437_p3 = scmp.lt.s32.totalorder %s5435_s13, %s5428_s26 }
  0xa0   : > { %p5432_p8 = pneg %p5431_p11  ;;  %p5438_p12 = por %p5437_p3, %p5436_p5 }
  0xa2   : > { %p5439_p13 = pnand %p5438_p12, %p5432_p8 }
  0xa4   : > { %5442 = shalt.err (!%p5439_p13)
}
  0xa5   : > { %4687 = dma.hbm_to_vmem [thread:$0]  (!%p5777_p9), %s5775_s27, 256, %s5781_s18, %s339_s23  }
  0xa6   : > { %p5983_p1 = scmp.ne.s32.totalorder %s5975_s16, 0 }
  0xa7   : > { %s5811_s24 = sand.u32 (!%p5983_p1), 1, %s5513_s10  }
  0xa8   : > { %359 = sbr.rel (%p5983_p1) target bundleno = 1427 (0x593), region = 56  ;;  %s4111_s20 = sshll.u32 (!%p5983_p1), %s5811_s24, 4 }
  0xa9   : > { %s362_s14 = scalar_lea.sflag (!%p5983_p1), [#allocation3], %s5811_s24  ;;  %s5815_s26 = scalar_lea.vmem (!%p5983_p1), [#allocation2], %s4111_s20 }
  0xaf   : > { %5488 = dma.done.wait (%p5757_p2), %s362_s14, 256  }
  0xb0   : > { %5490 = vsyncadd (%p5757_p2), %s362_s14, 4294967040  ;;  %p5984_p5 = scmp.eq.s32.totalorder %s5609_s15, 0 }
  0xb2   : > { %5492 = dma.done.wait (%p5984_p5), [#allocation6], 16512   ;;  %p5985_p8 = pmov %p5984_p5 }
  0xb3   : > { %p5986_p9 = pmov %p5984_p5 }
  0xb4   : > { %5494 = vsyncadd (%p5985_p8), [#allocation6], 4294950784 }
  0xb5   : > { %5496 = dma.done.wait (%p5986_p9), [#allocation9], 40960   ;;  %p5987_p7 = pmov %p5984_p5 }
  0xb6   : > { %p5988_p0 = pmov %p5984_p5 }
  0xb7   : > { %5498 = vsyncadd (%p5987_p7), [#allocation9], 4294926336 }
  0xb8   : > { %5500 = dma.done.wait (%p5988_p0), [#allocation12], 2048   ;;  %p5989_p4 = pmov %p5988_p0 }
  0xb9   : > { %v425_v0 = vld [vmem:[#allocation5] sm:$0xff]  ;;  %v422_v17 = vld [vmem:[%s5815_s26 + $0x8] sm:$0xff]  ;;  %v427_v31 = vld [vmem:[#allocation5 + $0x10] sm:$0xff]  ;;  %s4117_s17 = sshll.u32 %s5811_s24, 3  ;;  %s4584_s29 = sshll.u32 %s5609_s15, 7 }
  0xba   : > { %5502 = vsyncadd (%p5989_p4), [#allocation12], 4294965248  ;;  %v429_v1 = vld [vmem:[#allocation5 + $0x20] sm:$0xff]  ;;  %v5834_v18 = vpack.c.bf16 %v422_v17, %v422_v17  ;;  %v431_v32 = vld [vmem:[#allocation5 + $0x30] sm:$0xff]  ;;  %s419_s13 = scalar_lea.vmem [#allocation13], %s4117_s17  ;;  %s5990_s16 = sld [smem:[#allocation19_spill]] }
  0xbb   : > { %v433_v2 = vld [vmem:[#allocation5 + $0x40] sm:$0xff]  ;;  %v4119_v3 = vcombine.high %v425_v0, %v429_v1  ;;  %v4118_v4 = vcombine.low %v425_v0, %v429_v1  ;;  %v435_v33 = vld [vmem:[#allocation5 + $0x50] sm:$0xff]  ;;  %v4123_v34 = vcombine.high %v427_v31, %v431_v32  ;;  %v4122_v35 = vcombine.low %v427_v31, %v431_v32  ;;  %s3981_s20 = sshll.u32 %s419_s13, 4  ;;  %s3968_s27 = scalar_lea.sflag [#allocation4], %s5811_s24  ;;  %s5919_s20 = int_to_ptr.vmem [resolvable:$true] %s3981_s20 }
  0xbc   : > { %v437_v5 = vld [vmem:[#allocation5 + $0x60] sm:$0xff]  ;;  %1267 = vmatprep.mubr.bf16.mxu1 %v5834_v18  ;;  %1349 = vmatprep.mubr.bf16.mxu0 %v5834_v18  ;;  %v439_v36 = vld [vmem:[#allocation5 + $0x70] sm:$0xff]  ;;  %s5443_s18 = scalar_lea.vmem %s5919_s20, 128  ;;  %p5991_p6 = scmp.ne.s32.totalorder %s5980_s22, 0 }
  0xbd   : > { %v4127_v6 = vcombine.high %v433_v2, %v437_v5  ;;  %v441_v7 = vld [vmem:[#allocation5 + $0x80] sm:$0xff]  ;;  %1235 = vmatprep.subr.bf16.mxu1 %v4119_v3  ;;  %v4126_v9 = vcombine.low %v433_v2, %v437_v5  ;;  %v4131_v38 = vcombine.high %v435_v33, %v439_v36  ;;  %v443_v39 = vld [vmem:[#allocation5 + $0x90] sm:$0xff]  ;;  %1317 = vmatprep.subr.bf16.mxu0 %v4123_v34  ;;  %p5444_p2 = scmp.ne.s32.totalorder %s5919_s20, %s5443_s18  ;;  %s5537_s15 = smov [#allocation13]  }
  0xbe   : > { %v445_v8 = vld [vmem:[#allocation5 + $0xa0] sm:$0xff]  ;;  %1236 = vmatpush1.bf16.msra.mxu1 %v4118_v4  ;;  %v447_v40 = vld [vmem:[#allocation5 + $0xb0] sm:$0xff]  ;;  %1318 = vmatpush1.bf16.msra.mxu0 %v4122_v35  ;;  %v4130_v44 = vcombine.low %v435_v33, %v439_v36  ;;  %s5447_s17 = sshll.u32 %s5537_s15, 4  ;;  %s5448_s17 = int_to_ptr.vmem [resolvable:$false] %s5447_s17 }
  0xbf   : > { %1237 = vmatprep.subr.bf16.mxu1 %v4127_v6  ;;  %v4135_v10 = vcombine.high %v441_v7, %v445_v8  ;;  %v449_v11 = vld [vmem:[#allocation5 + $0xc0] sm:$0xff]  ;;  %v4134_v13 = vcombine.low %v441_v7, %v445_v8  ;;  %1319 = vmatprep.subr.bf16.mxu0 %v4131_v38  ;;  %v4139_v45 = vcombine.high %v443_v39, %v447_v40  ;;  %v451_v47 = vld [vmem:[#allocation5 + $0xd0] sm:$0xff]  ;;  %p5445_p10 = pnand %p5444_p2, %p5991_p6  ;;  %s5449_s23 = scalar_lea.vmem %s5448_s17, 256 }
  0xc0   : > { %v453_v12 = vld [vmem:[#allocation5 + $0xe0] sm:$0xff]  ;;  %v455_v48 = vld [vmem:[#allocation5 + $0xf0] sm:$0xff]  ;;  %v4138_v52 = vcombine.low %v443_v39, %v447_v40  ;;  %v426_v40 = vld [vmem:[#allocation5 + $0x8] sm:$0xff]  ;;  %s5917_s19 = scalar_lea.hbm %s5990_s16, %s4584_s29  ;;  %p5450_p3 = scmp.lt.s32.totalorder %s5919_s20, %s5448_s17 }
  0xc1   : > { %v4143_v14 = vcombine.high %v449_v11, %v453_v12  ;;  %v457_v15 = vld [vmem:[#allocation5 + $0x100] sm:$0xff]  ;;  %v4142_v19 = vcombine.low %v449_v11, %v453_v12  ;;  %v4147_v53 = vcombine.high %v451_v47, %v455_v48  ;;  %v459_v55 = vld [vmem:[#allocation5 + $0x110] sm:$0xff]  ;;  %v4146_v60 = vcombine.low %v451_v47, %v455_v48  ;;  %p5446_p11 = pneg %p5445_p10  ;;  %p5451_p12 = scmp.lt.s32.totalorder %s5449_s23, %s5443_s18 }
  0xc2   : > { %1238 = vmatpush1.bf16.msra.mxu1 %v4126_v9  ;;  %v461_v16 = vld [vmem:[#allocation5 + $0x120] sm:$0xff]  ;;  %1320 = vmatpush1.bf16.msra.mxu0 %v4130_v44  ;;  %v463_v56 = vld [vmem:[#allocation5 + $0x130] sm:$0xff] }
  0xc3   : > { %1239 = vmatprep.subr.bf16.mxu1 %v4135_v10  ;;  %v4151_v20 = vcombine.high %v457_v15, %v461_v16  ;;  %v465_v21 = vld [vmem:[#allocation5 + $0x140] sm:$0xff]  ;;  %v4150_v23 = vcombine.low %v457_v15, %v461_v16  ;;  %1321 = vmatprep.subr.bf16.mxu0 %v4139_v45  ;;  %v4155_v61 = vcombine.high %v459_v55, %v463_v56  ;;  %v467_v63 = vld [vmem:[#allocation5 + $0x150] sm:$0xff]  ;;  %p5452_p13 = por %p5451_p12, %p5450_p3 }
  0xc4   : > { %v469_v22 = vld [vmem:[#allocation5 + $0x160] sm:$0xff]  ;;  %v471_v0 = vld [vmem:[#allocation5 + $0x170] sm:$0xff]  ;;  %v4154_v4 = vcombine.low %v459_v55, %v463_v56 }
  0xc5   : > { %v4159_v24 = vcombine.high %v465_v21, %v469_v22  ;;  %v473_v25 = vld [vmem:[#allocation5 + $0x180] sm:$0xff]  ;;  %v4158_v27 = vcombine.low %v465_v21, %v469_v22  ;;  %v4163_v5 = vcombine.high %v467_v63, %v471_v0  ;;  %v475_v9 = vld [vmem:[#allocation5 + $0x190] sm:$0xff]  ;;  %v4162_v12 = vcombine.low %v467_v63, %v471_v0  ;;  %p5453_p1 = pnand %p5452_p13, %p5446_p11 }
  0xc6   : > { %1240 = vmatpush1.bf16.msra.mxu1 %v4134_v13  ;;  %v477_v26 = vld [vmem:[#allocation5 + $0x1a0] sm:$0xff]  ;;  %1322 = vmatpush1.bf16.msra.mxu0 %v4138_v52  ;;  %v479_v10 = vld [vmem:[#allocation5 + $0x1b0] sm:$0xff] }
  0xc7   : > { %1241 = vmatprep.subr.bf16.mxu1 %v4143_v14  ;;  %v4167_v28 = vcombine.high %v473_v25, %v477_v26  ;;  %v481_v29 = vld [vmem:[#allocation5 + $0x1c0] sm:$0xff]  ;;  %v4166_v37 = vcombine.low %v473_v25, %v477_v26  ;;  %1323 = vmatprep.subr.bf16.mxu0 %v4147_v53  ;;  %v4171_v13 = vcombine.high %v475_v9, %v479_v10  ;;  %v483_v17 = vld [vmem:[#allocation5 + $0x1d0] sm:$0xff] }
  0xc8   : > { %v485_v30 = vld [vmem:[#allocation5 + $0x1e0] sm:$0xff]  ;;  %v4170_v21 = vcombine.low %v475_v9, %v479_v10  ;;  %v491_v26 = vld [vmem:[#allocation5 + $0x210] sm:$0xff]  ;;  %v458_v10 = vld [vmem:[#allocation5 + $0x108] sm:$0xff] }
  0xc9   : > { %v4175_v41 = vcombine.high %v481_v29, %v485_v30  ;;  %v489_v42 = vld [vmem:[#allocation5 + $0x200] sm:$0xff]  ;;  %v4174_v46 = vcombine.low %v481_v29, %v485_v30  ;;  %v499_v34 = vld [vmem:[#allocation5 + $0x250] sm:$0xff] }
  0xca   : > { %1242 = vmatpush1.bf16.msra.mxu1 %v4142_v19  ;;  %v493_v43 = vld [vmem:[#allocation5 + $0x220] sm:$0xff]  ;;  %1324 = vmatpush1.bf16.msra.mxu0 %v4146_v60  ;;  %v487_v19 = vld [vmem:[#allocation5 + $0x1f0] sm:$0xff] }
  0xcb   : > { %1243 = vmatprep.subr.bf16.mxu1 %v4151_v20  ;;  %v4183_v49 = vcombine.high %v489_v42, %v493_v43  ;;  %v497_v50 = vld [vmem:[#allocation5 + $0x240] sm:$0xff]  ;;  %v4182_v54 = vcombine.low %v489_v42, %v493_v43  ;;  %1325 = vmatprep.subr.bf16.mxu0 %v4155_v61  ;;  %v4179_v22 = vcombine.high %v483_v17, %v487_v19  ;;  %v503_v35 = vld [vmem:[#allocation5 + $0x270] sm:$0xff] }
  0xcc   : > { %v501_v51 = vld [vmem:[#allocation5 + $0x260] sm:$0xff]  ;;  %v4178_v29 = vcombine.low %v483_v17, %v487_v19  ;;  %v4195_v38 = vcombine.high %v499_v34, %v503_v35  ;;  %v507_v42 = vld [vmem:[#allocation5 + $0x290] sm:$0xff]  ;;  %v466_v19 = vld [vmem:[#allocation5 + $0x148] sm:$0xff] }
  0xcd   : > { %v4191_v57 = vcombine.high %v497_v50, %v501_v51  ;;  %v505_v58 = vld [vmem:[#allocation5 + $0x280] sm:$0xff]  ;;  %v4190_v62 = vcombine.low %v497_v50, %v501_v51  ;;  %v511_v43 = vld [vmem:[#allocation5 + $0x2b0] sm:$0xff]  ;;  %v438_v50 = vld [vmem:[#allocation5 + $0x68] sm:$0xff] }
  0xce   : > { %1244 = vmatpush1.bf16.msra.mxu1 %v4150_v23  ;;  %v509_v59 = vld [vmem:[#allocation5 + $0x2a0] sm:$0xff]  ;;  %1326 = vmatpush1.bf16.msra.mxu0 %v4154_v4  ;;  %v4203_v47 = vcombine.high %v507_v42, %v511_v43  ;;  %v515_v51 = vld [vmem:[#allocation5 + $0x2d0] sm:$0xff] }
  0xcf   : > { %1245 = vmatprep.subr.bf16.mxu1 %v4159_v24  ;;  %v4199_v1 = vcombine.high %v505_v58, %v509_v59  ;;  %v513_v2 = vld [vmem:[#allocation5 + $0x2c0] sm:$0xff]  ;;  %v4198_v6 = vcombine.low %v505_v58, %v509_v59  ;;  %1327 = vmatprep.subr.bf16.mxu0 %v4163_v5  ;;  %v519_v52 = vld [vmem:[#allocation5 + $0x2f0] sm:$0xff]  ;;  %v442_v58 = vld [vmem:[#allocation5 + $0x88] sm:$0xff] }
  0xd0   : > { %v517_v3 = vld [vmem:[#allocation5 + $0x2e0] sm:$0xff]  ;;  %v4211_v56 = vcombine.high %v515_v51, %v519_v52  ;;  %v523_v59 = vld [vmem:[#allocation5 + $0x310] sm:$0xff]  ;;  %v4210_v63 = vcombine.low %v515_v51, %v519_v52  ;;  %v506_v51 = vld [vmem:[#allocation5 + $0x288] sm:$0xff] }
  0xd1   : > { %v521_v7 = vld [vmem:[#allocation5 + $0x300] sm:$0xff]  ;;  %v4207_v11 = vcombine.high %v513_v2, %v517_v3  ;;  %v4206_v14 = vcombine.low %v513_v2, %v517_v3  ;;  %v527_v60 = vld [vmem:[#allocation5 + $0x330] sm:$0xff]  ;;  %v450_v2 = vld [vmem:[#allocation5 + $0xc8] sm:$0xff] }
  0xd2   : > { %1246 = vmatpush1.bf16.msra.mxu1 %v4158_v27  ;;  %v525_v8 = vld [vmem:[#allocation5 + $0x320] sm:$0xff]  ;;  %1328 = vmatpush1.bf16.msra.mxu0 %v4162_v12  ;;  %v495_v27 = vld [vmem:[#allocation5 + $0x230] sm:$0xff]  ;;  %v4219_v0 = vcombine.high %v523_v59, %v527_v60  ;;  %v510_v52 = vld [vmem:[#allocation5 + $0x2a8] sm:$0xff] }
  0xd3   : > { %1247 = vmatprep.subr.bf16.mxu1 %v4167_v28  ;;  %v529_v15 = vld [vmem:[#allocation5 + $0x340] sm:$0xff]  ;;  %v4215_v20 = vcombine.high %v521_v7, %v525_v8  ;;  %1329 = vmatprep.subr.bf16.mxu0 %v4171_v13  ;;  %v4214_v23 = vcombine.low %v521_v7, %v525_v8  ;;  %v4187_v30 = vcombine.high %v491_v26, %v495_v27  ;;  %v531_v3 = vld [vmem:[#allocation5 + $0x350] sm:$0xff] }
  0xd4   : > { %v533_v16 = vld [vmem:[#allocation5 + $0x360] sm:$0xff]  ;;  %v535_v4 = vld [vmem:[#allocation5 + $0x370] sm:$0xff]  ;;  %v4218_v7 = vcombine.low %v523_v59, %v527_v60  ;;  %v518_v59 = vld [vmem:[#allocation5 + $0x2e8] sm:$0xff] }
  0xd5   : > { %v537_v24 = vld [vmem:[#allocation5 + $0x380] sm:$0xff]  ;;  %v4223_v28 = vcombine.high %v529_v15, %v533_v16  ;;  %v4222_v31 = vcombine.low %v529_v15, %v533_v16  ;;  %v4227_v8 = vcombine.high %v531_v3, %v535_v4  ;;  %v543_v12 = vld [vmem:[#allocation5 + $0x3b0] sm:$0xff]  ;;  %v4226_v15 = vcombine.low %v531_v3, %v535_v4  ;;  %v4773_v60 = vld [vmem:[#allocation8 + $0x80] ss:$16 sps:$4 sm:$0xff]  }
  0xd6   : > { %1248 = vmatpush1.bf16.msra.mxu1 %v4166_v37  ;;  %v541_v25 = vld [vmem:[#allocation5 + $0x3a0] sm:$0xff]  ;;  %1330 = vmatpush1.bf16.msra.mxu0 %v4170_v21  ;;  %v4186_v37 = vcombine.low %v491_v26, %v495_v27  ;;  %v551_v21 = vld [vmem:[#allocation5 + $0x3f0] sm:$0xff]  ;;  %v474_v27 = vld [vmem:[#allocation5 + $0x188] sm:$0xff] }
  0xd7   : > { %1249 = vmatprep.subr.bf16.mxu1 %v4175_v41  ;;  %1331 = vmatprep.subr.bf16.mxu0 %v4179_v22  ;;  %v545_v32 = vld [vmem:[#allocation5 + $0x3c0] sm:$0xff]  ;;  %v4231_v36 = vcombine.high %v537_v24, %v541_v25  ;;  %v4230_v39 = vcombine.low %v537_v24, %v541_v25  ;;  %v430_v41 = vld [vmem:[#allocation5 + $0x28] sm:$0xff] }
  0xd8   : > { %v549_v33 = vld [vmem:[#allocation5 + $0x3e0] sm:$0xff]  ;;  %v4121_v53 = vcombine.high %v426_v40, %v430_v41  ;;  %v4787_v4 = vld [vmem:[#allocation8 + $0xc4] ss:$16 sps:$4 sm:$0xff]  }
  0xd9   : > { %v4239_v44 = vcombine.high %v545_v32, %v549_v33  ;;  %v421_v45 = vld [vmem:[%s5815_s26] sm:$0xff]  ;;  %v4238_v48 = vcombine.low %v545_v32, %v549_v33  ;;  %v482_v33 = vld [vmem:[#allocation5 + $0x1c8] sm:$0xff] }
  0xda   : > { %1250 = vmatpush1.bf16.msra.mxu1 %v4174_v46  ;;  %1332 = vmatpush1.bf16.msra.mxu0 %v4178_v29  ;;  %v4194_v46 = vcombine.low %v499_v34, %v503_v35  ;;  %v5839_v55 = vpack.c.bf16 %v421_v45, %v421_v45  ;;  %v486_v34 = vld [vmem:[#allocation5 + $0x1e8] sm:$0xff] }
  0xdb   : > { %1251 = vmatprep.subr.bf16.mxu1 %v4183_v49  ;;  %1333 = vmatprep.subr.bf16.mxu0 %v4187_v30  ;;  %v434_v49 = vld [vmem:[#allocation5 + $0x48] sm:$0xff] }
  0xdc   : > { %v4129_v61 = vcombine.high %v434_v49, %v438_v50  ;;  %v4751_v30 = vld [vmem:[#allocation8 + $0x4] ss:$16 sps:$4 sm:$0xff]   ;;  %v4749_v35 = vld [vmem:[#allocation8] ss:$16 sps:$4 sm:$0xff]  }
  0xdd   : > { %v498_v45 = vld [vmem:[#allocation5 + $0x248] sm:$0xff] }
  0xde   : > { %1252 = vmatpush1.bf16.msra.mxu1 %v4182_v54  ;;  %1334 = vmatpush1.bf16.msra.mxu0 %v4186_v37  ;;  %v4202_v54 = vcombine.low %v507_v42, %v511_v43  ;;  %v4757_v37 = vld [vmem:[#allocation8 + $0x24] ss:$16 sps:$4 sm:$0xff]   ;;  %v4177_v42 = vcombine.high %v482_v33, %v486_v34 }
  0xdf   : > { %1253 = vmatprep.subr.bf16.mxu1 %v4191_v57  ;;  %1335 = vmatprep.subr.bf16.mxu0 %v4195_v38  ;;  %v4120_v57 = vcombine.low %v426_v40, %v430_v41  ;;  %v494_v40 = vld [vmem:[#allocation5 + $0x228] sm:$0xff] }
  0xe0   : > { %v4755_v41 = vld [vmem:[#allocation8 + $0x20] ss:$16 sps:$4 sm:$0xff]   ;;  %v4763_v43 = vld [vmem:[#allocation8 + $0x44] ss:$16 sps:$4 sm:$0xff]  }
  0xe2   : > { %1254 = vmatpush1.bf16.msra.mxu1 %v4190_v62  ;;  %1336 = vmatpush1.bf16.msra.mxu0 %v4194_v46  ;;  %v446_v62 = vld [vmem:[#allocation5 + $0xa8] sm:$0xff] }
  0xe3   : > { %1255 = vmatprep.subr.bf16.mxu1 %v4199_v1  ;;  %1337 = vmatprep.subr.bf16.mxu0 %v4203_v47  ;;  %v4128_v1 = vcombine.low %v434_v49, %v438_v50  ;;  %v4137_v5 = vcombine.high %v442_v58, %v446_v62  ;;  %v4136_v9 = vcombine.low %v442_v58, %v446_v62  ;;  %v502_v46 = vld [vmem:[#allocation5 + $0x268] sm:$0xff] }
  0xe4   : > { %v4761_v47 = vld [vmem:[#allocation8 + $0x40] ss:$16 sps:$4 sm:$0xff]   ;;  %v4769_v49 = vld [vmem:[#allocation8 + $0x64] ss:$16 sps:$4 sm:$0xff]  }
  0xe5   : > { %v514_v58 = vld [vmem:[#allocation5 + $0x2c8] sm:$0xff] }
  0xe6   : > { %1256 = vmatpush1.bf16.msra.mxu1 %v4198_v6  ;;  %1338 = vmatpush1.bf16.msra.mxu0 %v4202_v54  ;;  %v454_v6 = vld [vmem:[#allocation5 + $0xe8] sm:$0xff]  ;;  %v4193_v54 = vcombine.high %v498_v45, %v502_v46  ;;  %v4209_v3 = vcombine.high %v514_v58, %v518_v59 }
  0xe7   : > { %1257 = vmatprep.subr.bf16.mxu1 %v4207_v11  ;;  %1339 = vmatprep.subr.bf16.mxu0 %v4211_v56  ;;  %v539_v11 = vld [vmem:[#allocation5 + $0x390] sm:$0xff]  ;;  %v4145_v13 = vcombine.high %v450_v2, %v454_v6  ;;  %v4144_v17 = vcombine.low %v450_v2, %v454_v6  ;;  %v4775_v56 = vld [vmem:[#allocation8 + $0x84] ss:$16 sps:$4 sm:$0xff]   ;;  %v4779_v2 = vld [vmem:[#allocation8 + $0xa0] ss:$16 sps:$4 sm:$0xff]  }
  0xe8   : > { %v4235_v16 = vcombine.high %v539_v11, %v543_v12  ;;  %v4234_v24 = vcombine.low %v539_v11, %v543_v12  ;;  %v4781_v62 = vld [vmem:[#allocation8 + $0xa4] ss:$16 sps:$4 sm:$0xff]  }
  0xe9   : > { %v530_v6 = vld [vmem:[#allocation5 + $0x348] sm:$0xff] }
  0xea   : > { %1258 = vmatpush1.bf16.msra.mxu1 %v4206_v14  ;;  %1340 = vmatpush1.bf16.msra.mxu0 %v4210_v63  ;;  %v462_v14 = vld [vmem:[#allocation5 + $0x128] sm:$0xff]  ;;  %v4200_v63 = vcombine.low %v506_v51, %v510_v52 }
  0xeb   : > { %1259 = vmatprep.subr.bf16.mxu1 %v4215_v20  ;;  %1341 = vmatprep.subr.bf16.mxu0 %v4219_v0  ;;  %v547_v20 = vld [vmem:[#allocation5 + $0x3d0] sm:$0xff]  ;;  %v4153_v22 = vcombine.high %v458_v10, %v462_v14  ;;  %v4152_v26 = vcombine.low %v458_v10, %v462_v14  ;;  %v522_v0 = vld [vmem:[#allocation5 + $0x308] sm:$0xff] }
  0xec   : > { %v4243_v25 = vcombine.high %v547_v20, %v551_v21  ;;  %v4793_v10 = vld [vmem:[#allocation8 + $0xe4] ss:$16 sps:$4 sm:$0xff]   ;;  %v4791_v14 = vld [vmem:[#allocation8 + $0xe0] ss:$16 sps:$4 sm:$0xff]  }
  0xed   : > { %v538_v12 = vld [vmem:[#allocation5 + $0x388] sm:$0xff] }
  0xee   : > { %1260 = vmatpush1.bf16.msra.mxu1 %v4214_v23  ;;  %1342 = vmatpush1.bf16.msra.mxu0 %v4218_v7  ;;  %v470_v23 = vld [vmem:[#allocation5 + $0x168] sm:$0xff] }
  0xef   : > { %1261 = vmatprep.subr.bf16.mxu1 %v4223_v28  ;;  %1343 = vmatprep.subr.bf16.mxu0 %v4227_v8  ;;  %v478_v28 = vld [vmem:[#allocation5 + $0x1a8] sm:$0xff]  ;;  %v4161_v29 = vcombine.high %v466_v19, %v470_v23  ;;  %v4160_v32 = vcombine.low %v466_v19, %v470_v23 }
  0xf0   : > { %v4168_v38 = vcombine.low %v474_v27, %v478_v28  ;;  %v534_v7 = vld [vmem:[#allocation5 + $0x368] sm:$0xff] }
  0xf1   : > { %v4785_v8 = vld [vmem:[#allocation8 + $0xc0] ss:$16 sps:$4 sm:$0xff]   ;;  %v4805_v23 = vld [vmem:[#allocation8 + $0x124] ss:$16 sps:$4 sm:$0xff]  }
  0xf2   : > { %1262 = vmatpush1.bf16.msra.mxu1 %v4222_v31  ;;  %1344 = vmatpush1.bf16.msra.mxu0 %v4226_v15  ;;  %v4242_v31 = vcombine.low %v547_v20, %v551_v21  ;;  %v4225_v15 = vcombine.high %v530_v6, %v534_v7  ;;  %v546_v19 = vld [vmem:[#allocation5 + $0x3c8] sm:$0xff] }
  0xf3   : > { %1263 = vmatprep.subr.bf16.mxu1 %v4231_v36  ;;  %1345 = vmatprep.subr.bf16.mxu0 %v4235_v16  ;;  %v4169_v36 = vcombine.high %v474_v27, %v478_v28  ;;  %v4799_v16 = vld [vmem:[#allocation8 + $0x104] ss:$16 sps:$4 sm:$0xff]   ;;  %v4797_v21 = vld [vmem:[#allocation8 + $0x100] ss:$16 sps:$4 sm:$0xff]  }
  0xf4   : > { %v550_v20 = vld [vmem:[#allocation5 + $0x3e8] sm:$0xff] }
  0xf5   : > { %v4803_v27 = vld [vmem:[#allocation8 + $0x120] ss:$16 sps:$4 sm:$0xff]   ;;  %v4241_v28 = vcombine.high %v546_v19, %v550_v20 }
  0xf6   : > { %1264 = vmatpush1.bf16.msra.mxu1 %v4230_v39  ;;  %1346 = vmatpush1.bf16.msra.mxu0 %v4234_v24  ;;  %v490_v39 = vld [vmem:[#allocation5 + $0x208] sm:$0xff] }
  0xf7   : > { %1265 = vmatprep.subr.bf16.mxu1 %v4239_v44  ;;  %1347 = vmatprep.subr.bf16.mxu0 %v4243_v25  ;;  %v4176_v44 = vcombine.low %v482_v33, %v486_v34  ;;  %v4184_v50 = vcombine.low %v490_v39, %v494_v40  ;;  %v428_v25 = vld [vmem:[#allocation5 + $0x18] sm:$0xff] }
  0xf8   : > { %v4809_v33 = vld [vmem:[#allocation8 + $0x140] ss:$16 sps:$4 sm:$0xff]  }
  0xfa   : > { %1266 = vmatpush1.bf16.msra.mxu1 %v4238_v48  ;;  %1348 = vmatpush1.bf16.msra.mxu0 %v4242_v31  ;;  %v4185_v48 = vcombine.high %v490_v39, %v494_v40  ;;  %v436_v31 = vld [vmem:[#allocation5 + $0x58] sm:$0xff] }
  0xfb   : > { %1276 = vmatprep.subr.bf16.mxu1 %v4121_v53  ;;  %2973 = vmatprep.subr.bf16.mxu0 %v4751_v30  ;;  %v4767_v53 = vld [vmem:[#allocation8 + $0x60] ss:$16 sps:$4 sm:$0xff]   ;;  %v4240_v30 = vcombine.low %v546_v19, %v550_v20  ;;  %v4847_v20 = vld [vmem:[#allocation8 + $0x204] ss:$16 sps:$4 sm:$0xff]  }
  0xfc   : > { %v4815_v39 = vld [vmem:[#allocation8 + $0x160] ss:$16 sps:$4 sm:$0xff]  }
  0xfd   : > { %1268 = vmatmul.mubr.bf16.vlgmr.msra.gmra.mrb[0].mxu1 %v5839_v55  ;;  %1350 = vmatmul.mubr.bf16.vlgmr.msra.gmra.mrb[0].mxu0 %v5839_v55 }
  0xfe   : > { %1277 = vmatpush1.bf16.msra.mxu1 %v4120_v57  ;;  %1308 = vmatprep.mubr.bf16.mxu1 %v5834_v18  ;;  %v4192_v57 = vcombine.low %v498_v45, %v502_v46  ;;  %v460_v46 = vld [vmem:[#allocation5 + $0x118] sm:$0xff] }
  0xff   : > { %1278 = vmatprep.subr.bf16.mxu1 %v4129_v61  ;;  %2974 = vmatpush1.bf16.msra.mxu0 %v4749_v35  ;;  %v4201_v61 = vcombine.high %v506_v51, %v510_v52  ;;  %v4817_v35 = vld [vmem:[#allocation8 + $0x164] ss:$16 sps:$4 sm:$0xff]  }
 0x100   : > { %2975 = vmatprep.subr.bf16.mxu0 %v4757_v37  ;;  %v444_v37 = vld [vmem:[#allocation5 + $0x98] sm:$0xff] }
 0x101   : > { %v472_v51 = vld [vmem:[#allocation5 + $0x178] sm:$0xff] }
 0x102   : > { %1279 = vmatpush1.bf16.msra.mxu1 %v4128_v1  ;;  %v526_v1 = vld [vmem:[#allocation5 + $0x328] sm:$0xff] }
 0x103   : > { %1280 = vmatprep.subr.bf16.mxu1 %v4137_v5  ;;  %2976 = vmatpush1.bf16.msra.mxu0 %v4755_v41  ;;  %v4208_v5 = vcombine.low %v514_v58, %v518_v59  ;;  %v4216_v11 = vcombine.low %v522_v0, %v526_v1  ;;  %v484_v59 = vld [vmem:[#allocation5 + $0x1d8] sm:$0xff] }
 0x104   : > { %2977 = vmatprep.subr.bf16.mxu0 %v4763_v43  ;;  %v456_v43 = vld [vmem:[#allocation5 + $0xf8] sm:$0xff] }
 0x106   : > { %1281 = vmatpush1.bf16.msra.mxu1 %v4136_v9  ;;  %v4217_v9 = vcombine.high %v522_v0, %v526_v1  ;;  %v492_v1 = vld [vmem:[#allocation5 + $0x218] sm:$0xff] }
 0x107   : > { %1282 = vmatprep.subr.bf16.mxu1 %v4145_v13  ;;  %2978 = vmatpush1.bf16.msra.mxu0 %v4761_v47  ;;  %v542_v13 = vld [vmem:[#allocation5 + $0x3a8] sm:$0xff]  ;;  %v464_v47 = vld [vmem:[#allocation5 + $0x138] sm:$0xff] }
 0x108   : > { %2979 = vmatprep.subr.bf16.mxu0 %v4769_v49  ;;  %v4232_v24 = vcombine.low %v538_v12, %v542_v13  ;;  %v4157_v52 = vcombine.high %v460_v46, %v464_v47 }
 0x10a   : > { %1283 = vmatpush1.bf16.msra.mxu1 %v4144_v17  ;;  %v4224_v17 = vcombine.low %v530_v6, %v534_v7  ;;  %v500_v7 = vld [vmem:[#allocation5 + $0x258] sm:$0xff] }
 0x10b   : > { %1284 = vmatprep.subr.bf16.mxu1 %v4153_v22  ;;  %2980 = vmatpush1.bf16.msra.mxu0 %v4767_v53  ;;  %v4233_v22 = vcombine.high %v538_v12, %v542_v13  ;;  %v4156_v53 = vcombine.low %v460_v46, %v464_v47  ;;  %v508_v13 = vld [vmem:[#allocation5 + $0x298] sm:$0xff]  ;;  %v4766_v46 = vld [vmem:[#allocation8 + $0x4c] ss:$16 sps:$4 sm:$0xff]   ;;  %v4764_v47 = vld [vmem:[#allocation8 + $0x48] ss:$16 sps:$4 sm:$0xff]  }
 0x10c   : > { %2981 = vmatprep.subr.bf16.mxu0 %v4775_v56  ;;  %v480_v56 = vld [vmem:[#allocation5 + $0x1b8] sm:$0xff] }
 0x10e   : > { %1285 = vmatpush1.bf16.msra.mxu1 %v4152_v26  ;;  %v432_v26 = vld [vmem:[#allocation5 + $0x38] sm:$0xff] }
 0x10f   : > { %1286 = vmatprep.subr.bf16.mxu1 %v4161_v29  ;;  %2982 = vmatpush1.bf16.msra.mxu0 %v4773_v60  ;;  %v4811_v29 = vld [vmem:[#allocation8 + $0x144] ss:$16 sps:$4 sm:$0xff]   ;;  %v4125_v34 = vcombine.high %v428_v25, %v432_v26 }
 0x110   : > { %2983 = vmatprep.subr.bf16.mxu0 %v4781_v62  ;;  %v4823_v60 = vld [vmem:[#allocation8 + $0x184] ss:$16 sps:$4 sm:$0xff]   ;;  %v4821_v62 = vld [vmem:[#allocation8 + $0x180] ss:$16 sps:$4 sm:$0xff]  }
 0x112   : > { %1287 = vmatpush1.bf16.msra.mxu1 %v4160_v32  ;;  %v440_v32 = vld [vmem:[#allocation5 + $0x78] sm:$0xff] }
 0x113   : > { %1288 = vmatprep.subr.bf16.mxu1 %v4169_v36  ;;  %2984 = vmatpush1.bf16.msra.mxu0 %v4779_v2  ;;  %v4124_v36 = vcombine.low %v428_v25, %v432_v26  ;;  %v4133_v40 = vcombine.high %v436_v31, %v440_v32  ;;  %v4132_v41 = vcombine.low %v436_v31, %v440_v32  ;;  %v4829_v2 = vld [vmem:[#allocation8 + $0x1a4] ss:$16 sps:$4 sm:$0xff]  }
 0x114   : > { %2985 = vmatprep.subr.bf16.mxu0 %v4787_v4  ;;  %v4827_v4 = vld [vmem:[#allocation8 + $0x1a0] ss:$16 sps:$4 sm:$0xff]  }
 0x115   : > { %v524_v25 = vld [vmem:[#allocation5 + $0x318] sm:$0xff] }
 0x116   : > { %1289 = vmatpush1.bf16.msra.mxu1 %v4168_v38  ;;  %v448_v38 = vld [vmem:[#allocation5 + $0xb8] sm:$0xff] }
 0x117   : > { %1290 = vmatprep.subr.bf16.mxu1 %v4177_v42  ;;  %2986 = vmatpush1.bf16.msra.mxu0 %v4785_v8  ;;  %v452_v42 = vld [vmem:[#allocation5 + $0xd8] sm:$0xff]  ;;  %v4140_v45 = vcombine.low %v444_v37, %v448_v38 }
 0x118   : > { %2987 = vmatprep.subr.bf16.mxu0 %v4793_v10  ;;  %v4148_v49 = vcombine.low %v452_v42, %v456_v43  ;;  %v4835_v8 = vld [vmem:[#allocation8 + $0x1c4] ss:$16 sps:$4 sm:$0xff]   ;;  %v4833_v10 = vld [vmem:[#allocation8 + $0x1c0] ss:$16 sps:$4 sm:$0xff]  }
 0x119   : > { %v528_v26 = vld [vmem:[#allocation5 + $0x338] sm:$0xff] }
 0x11a   : > { %1291 = vmatpush1.bf16.msra.mxu1 %v4176_v44  ;;  %v4141_v44 = vcombine.high %v444_v37, %v448_v38  ;;  %v4220_v31 = vcombine.low %v524_v25, %v528_v26  ;;  %v548_v37 = vld [vmem:[#allocation5 + $0x3d8] sm:$0xff] }
 0x11b   : > { %1292 = vmatprep.subr.bf16.mxu1 %v4185_v48  ;;  %2988 = vmatpush1.bf16.msra.mxu0 %v4791_v14  ;;  %v4149_v48 = vcombine.high %v452_v42, %v456_v43  ;;  %v4841_v14 = vld [vmem:[#allocation8 + $0x1e4] ss:$16 sps:$4 sm:$0xff]   ;;  %v4754_v42 = vld [vmem:[#allocation8 + $0xc] ss:$16 sps:$4 sm:$0xff]   ;;  %v4752_v43 = vld [vmem:[#allocation8 + $0x8] ss:$16 sps:$4 sm:$0xff]  }
 0x11c   : > { %2989 = vmatprep.subr.bf16.mxu0 %v4799_v16  ;;  %v4839_v16 = vld [vmem:[#allocation8 + $0x1e0] ss:$16 sps:$4 sm:$0xff]  }
 0x11d   : > { %v552_v38 = vld [vmem:[#allocation5 + $0x3f8] sm:$0xff] }
 0x11e   : > { %1293 = vmatpush1.bf16.msra.mxu1 %v4184_v50  ;;  %v468_v50 = vld [vmem:[#allocation5 + $0x158] sm:$0xff] }
 0x11f   : > { %1294 = vmatprep.subr.bf16.mxu1 %v4193_v54  ;;  %2990 = vmatpush1.bf16.msra.mxu0 %v4797_v21  ;;  %v476_v54 = vld [vmem:[#allocation5 + $0x198] sm:$0xff] }
 0x120   : > { %2991 = vmatprep.subr.bf16.mxu0 %v4805_v23  ;;  %v4173_v58 = vcombine.high %v476_v54, %v480_v56  ;;  %v516_v21 = vld [vmem:[#allocation5 + $0x2d8] sm:$0xff] }
 0x122   : > { %1295 = vmatpush1.bf16.msra.mxu1 %v4192_v57  ;;  %v4164_v57 = vcombine.low %v468_v50, %v472_v51 }
 0x123   : > { %1296 = vmatprep.subr.bf16.mxu1 %v4201_v61  ;;  %2992 = vmatpush1.bf16.msra.mxu0 %v4803_v27  ;;  %v488_v61 = vld [vmem:[#allocation5 + $0x1f8] sm:$0xff] }
 0x124   : > { %2993 = vmatprep.subr.bf16.mxu0 %v4811_v29  ;;  %v4181_v0 = vcombine.high %v484_v59, %v488_v61  ;;  %v532_v29 = vld [vmem:[#allocation5 + $0x358] sm:$0xff] }
 0x126   : > { %1297 = vmatpush1.bf16.msra.mxu1 %v4200_v63  ;;  %v4172_v63 = vcombine.low %v476_v54, %v480_v56  ;;  %v4788_v54 = vld [vmem:[#allocation8 + $0xc8] ss:$16 sps:$4 sm:$0xff]   ;;  %v4796_v56 = vld [vmem:[#allocation8 + $0xec] ss:$16 sps:$4 sm:$0xff]  }
 0x127   : > { %1298 = vmatprep.subr.bf16.mxu1 %v4209_v3  ;;  %2994 = vmatpush1.bf16.msra.mxu0 %v4809_v33  ;;  %v496_v3 = vld [vmem:[#allocation5 + $0x238] sm:$0xff] }
 0x128   : > { %2995 = vmatprep.subr.bf16.mxu0 %v4817_v35  ;;  %v4189_v6 = vcombine.high %v492_v1, %v496_v3  ;;  %v540_v33 = vld [vmem:[#allocation5 + $0x398] sm:$0xff] }
 0x12a   : > { %1299 = vmatpush1.bf16.msra.mxu1 %v4208_v5  ;;  %v4180_v5 = vcombine.low %v484_v59, %v488_v61  ;;  %v4808_v59 = vld [vmem:[#allocation8 + $0x12c] ss:$16 sps:$4 sm:$0xff]  }
 0x12b   : > { %1300 = vmatprep.subr.bf16.mxu1 %v4217_v9  ;;  %2996 = vmatpush1.bf16.msra.mxu0 %v4815_v39  ;;  %v504_v9 = vld [vmem:[#allocation5 + $0x278] sm:$0xff]  ;;  %v4814_v61 = vld [vmem:[#allocation8 + $0x14c] ss:$16 sps:$4 sm:$0xff]  }
 0x12c   : > { %2997 = vmatprep.subr.bf16.mxu0 %v4823_v60  ;;  %v4197_v12 = vcombine.high %v500_v7, %v504_v9  ;;  %v4806_v60 = vld [vmem:[#allocation8 + $0x128] ss:$16 sps:$4 sm:$0xff]  }
 0x12e   : > { %1301 = vmatpush1.bf16.msra.mxu1 %v4216_v11  ;;  %v4188_v11 = vcombine.low %v492_v1, %v496_v3  ;;  %v4826_v1 = vld [vmem:[#allocation8 + $0x18c] ss:$16 sps:$4 sm:$0xff]  }
 0x12f   : > { %1302 = vmatprep.subr.bf16.mxu1 %v4225_v15  ;;  %2998 = vmatpush1.bf16.msra.mxu0 %v4821_v62  ;;  %v512_v15 = vld [vmem:[#allocation5 + $0x2b8] sm:$0xff]  ;;  %v4812_v62 = vld [vmem:[#allocation8 + $0x148] ss:$16 sps:$4 sm:$0xff]   ;;  %v4832_v3 = vld [vmem:[#allocation8 + $0x1ac] ss:$16 sps:$4 sm:$0xff]  }
 0x130   : > { %2999 = vmatprep.subr.bf16.mxu0 %v4829_v2  ;;  %v4205_v19 = vcombine.high %v508_v13, %v512_v15  ;;  %v4204_v23 = vcombine.low %v508_v13, %v512_v15  ;;  %v4824_v2 = vld [vmem:[#allocation8 + $0x188] ss:$16 sps:$4 sm:$0xff]  }
 0x131   : > { %v5852_v13 = vld [vmem:[#allocation7] sm:$0xff] }
 0x132   : > { %1303 = vmatpush1.bf16.msra.mxu1 %v4224_v17  ;;  %v4196_v17 = vcombine.low %v500_v7, %v504_v9  ;;  %v4844_v7 = vld [vmem:[#allocation8 + $0x1ec] ss:$16 sps:$4 sm:$0xff]  }
 0x133   : > { %1304 = vmatprep.subr.bf16.mxu1 %v4233_v22  ;;  %3000 = vmatpush1.bf16.msra.mxu0 %v4827_v4  ;;  %v520_v22 = vld [vmem:[#allocation5 + $0x2f8] sm:$0xff]  ;;  %v4830_v4 = vld [vmem:[#allocation8 + $0x1a8] ss:$16 sps:$4 sm:$0xff]   ;;  %v4850_v9 = vld [vmem:[#allocation8 + $0x20c] ss:$16 sps:$4 sm:$0xff]  }
 0x134   : > { %3001 = vmatprep.subr.bf16.mxu0 %v4835_v8  ;;  %v4212_v27 = vcombine.low %v516_v21, %v520_v22  ;;  %v4842_v8 = vld [vmem:[#allocation8 + $0x1e8] ss:$16 sps:$4 sm:$0xff]  }
 0x136   : > { %1305 = vmatpush1.bf16.msra.mxu1 %v4232_v24  ;;  %v4213_v24 = vcombine.high %v516_v21, %v520_v22 }
 0x137   : > { %1306 = vmatprep.subr.bf16.mxu1 %v4241_v28  ;;  %3002 = vmatpush1.bf16.msra.mxu0 %v4833_v10  ;;  %v4221_v28 = vcombine.high %v524_v25, %v528_v26  ;;  %v555_v10 = vlaneseq }
 0x138   : > { %3003 = vmatprep.subr.bf16.mxu0 %v4841_v14 }
 0x13a   : > { %1307 = vmatpush1.bf16.msra.mxu1 %v4240_v30  ;;  %v536_v30 = vld [vmem:[#allocation5 + $0x378] sm:$0xff] }
 0x13b   : > { %1358 = vmatprep.subr.bf16.mxu1 %v4125_v34  ;;  %3004 = vmatpush1.bf16.msra.mxu0 %v4839_v16  ;;  %v4229_v32 = vcombine.high %v532_v29, %v536_v30  ;;  %v544_v34 = vld [vmem:[#allocation5 + $0x3b8] sm:$0xff]  ;;  %v4228_v35 = vcombine.low %v532_v29, %v536_v30 }
 0x13c   : > { %3014 = vmatprep.subr.bf16.mxu0 %v4847_v20  ;;  %v4236_v39 = vcombine.low %v540_v33, %v544_v34  ;;  %v4853_v30 = vld [vmem:[#allocation8 + $0x224] ss:$16 sps:$4 sm:$0xff]  }
 0x13d   : > { %1309 = vmatmul.mubr.bf16.vlgmr.msra.gmra.mrb[4].mxu1 %v5839_v55 }
 0x13e   : > { %1359 = vmatpush1.bf16.msra.mxu1 %v4124_v36  ;;  %1390 = vmatprep.mubr.bf16.mxu1 %v5834_v18  ;;  %v4165_v18 = vcombine.high %v468_v50, %v472_v51  ;;  %v4237_v36 = vcombine.high %v540_v33, %v544_v34  ;;  %v4778_v50 = vld [vmem:[#allocation8 + $0x8c] ss:$16 sps:$4 sm:$0xff]   ;;  %v4776_v51 = vld [vmem:[#allocation8 + $0x88] ss:$16 sps:$4 sm:$0xff]   ;;  %v4859_v34 = vld [vmem:[#allocation8 + $0x244] ss:$16 sps:$4 sm:$0xff]  }
 0x13f   : > { %1360 = vmatprep.subr.bf16.mxu1 %v4133_v40  ;;  %v4245_v40 = vcombine.high %v548_v37, %v552_v38  ;;  %v4854_v33 = vld [vmem:[#allocation8 + $0x228] ss:$16 sps:$4 sm:$0xff]  }
 0x142   : > { %1361 = vmatpush1.bf16.msra.mxu1 %v4132_v41  ;;  %v4244_v41 = vcombine.low %v548_v37, %v552_v38  ;;  %v4857_v37 = vld [vmem:[#allocation8 + $0x240] ss:$16 sps:$4 sm:$0xff]   ;;  %v4860_v38 = vld [vmem:[#allocation8 + $0x248] ss:$16 sps:$4 sm:$0xff]  }
 0x143   : > { %1362 = vmatprep.subr.bf16.mxu1 %v4141_v44  ;;  %v4760_v44 = vld [vmem:[#allocation8 + $0x2c] ss:$16 sps:$4 sm:$0xff]  }
 0x146   : > { %1363 = vmatpush1.bf16.msra.mxu1 %v4140_v45  ;;  %v4758_v45 = vld [vmem:[#allocation8 + $0x28] ss:$16 sps:$4 sm:$0xff]  }
 0x147   : > { %1364 = vmatprep.subr.bf16.mxu1 %v4149_v48  ;;  %v4772_v48 = vld [vmem:[#allocation8 + $0x6c] ss:$16 sps:$4 sm:$0xff]  }
 0x14a   : > { %1365 = vmatpush1.bf16.msra.mxu1 %v4148_v49  ;;  %v4770_v49 = vld [vmem:[#allocation8 + $0x68] ss:$16 sps:$4 sm:$0xff]  }
 0x14b   : > { %1366 = vmatprep.subr.bf16.mxu1 %v4157_v52  ;;  %v4784_v52 = vld [vmem:[#allocation8 + $0xac] ss:$16 sps:$4 sm:$0xff]  }
 0x14e   : > { %1367 = vmatpush1.bf16.msra.mxu1 %v4156_v53  ;;  %v4782_v53 = vld [vmem:[#allocation8 + $0xa8] ss:$16 sps:$4 sm:$0xff]  }
 0x14f   : > { %1368 = vmatprep.subr.bf16.mxu1 %v4165_v18  ;;  %v4794_v18 = vld [vmem:[#allocation8 + $0xe8] ss:$16 sps:$4 sm:$0xff]  }
 0x152   : > { %1369 = vmatpush1.bf16.msra.mxu1 %v4164_v57  ;;  %v4802_v57 = vld [vmem:[#allocation8 + $0x10c] ss:$16 sps:$4 sm:$0xff]  }
 0x153   : > { %1370 = vmatprep.subr.bf16.mxu1 %v4173_v58  ;;  %v4800_v58 = vld [vmem:[#allocation8 + $0x108] ss:$16 sps:$4 sm:$0xff]  }
 0x156   : > { %1371 = vmatpush1.bf16.msra.mxu1 %v4172_v63  ;;  %v4820_v63 = vld [vmem:[#allocation8 + $0x16c] ss:$16 sps:$4 sm:$0xff]  }
 0x157   : > { %1372 = vmatprep.subr.bf16.mxu1 %v4181_v0  ;;  %v4818_v0 = vld [vmem:[#allocation8 + $0x168] ss:$16 sps:$4 sm:$0xff]  }
 0x15a   : > { %1373 = vmatpush1.bf16.msra.mxu1 %v4180_v5  ;;  %v4838_v5 = vld [vmem:[#allocation8 + $0x1cc] ss:$16 sps:$4 sm:$0xff]  }
 0x15b   : > { %1374 = vmatprep.subr.bf16.mxu1 %v4189_v6  ;;  %v4836_v6 = vld [vmem:[#allocation8 + $0x1c8] ss:$16 sps:$4 sm:$0xff]  }
 0x15e   : > { %1375 = vmatpush1.bf16.msra.mxu1 %v4188_v11  ;;  %v5847_v11 = vshrl.u32 %v555_v10, 7  ;;  %v4913_v10 = vld [vmem:[#allocation8 + $0x364] ss:$16 sps:$4 sm:$0xff]  }
 0x15f   : > { %1376 = vmatprep.subr.bf16.mxu1 %v4197_v12 }
 0x160   : > { %v5850_v12 = vsub.s32 0, %v5847_v11  ;;  %v5855_v14 = vsub.s32 1, %v5847_v11 }
 0x162   : > { %1377 = vmatpush1.bf16.msra.mxu1 %v4196_v17  ;;  %v558_v15 = vrot.slane %v5852_v13, %v5850_v12  ;;  %v562_v16 = vrot.slane %v5852_v13, %v5855_v14 }
 0x163   : > { %1378 = vmatprep.subr.bf16.mxu1 %v4205_v19 }
 0x166   : > { %1379 = vmatpush1.bf16.msra.mxu1 %v4204_v23 }
 0x167   : > { %1380 = vmatprep.subr.bf16.mxu1 %v4213_v24 }
 0x16a   : > { %1381 = vmatpush1.bf16.msra.mxu1 %v4212_v27  ;;  %v4845_v27 = vld [vmem:[#allocation8 + $0x200] ss:$16 sps:$4 sm:$0xff]  }
 0x16b   : > { %1382 = vmatprep.subr.bf16.mxu1 %v4221_v28  ;;  %v4848_v28 = vld [vmem:[#allocation8 + $0x208] ss:$16 sps:$4 sm:$0xff]  }
 0x16e   : > { %1383 = vmatpush1.bf16.msra.mxu1 %v4220_v31  ;;  %v4856_v31 = vld [vmem:[#allocation8 + $0x22c] ss:$16 sps:$4 sm:$0xff]  }
 0x16f   : > { %1384 = vmatprep.subr.bf16.mxu1 %v4229_v32  ;;  %v4851_v32 = vld [vmem:[#allocation8 + $0x220] ss:$16 sps:$4 sm:$0xff]  }
 0x172   : > { %1385 = vmatpush1.bf16.msra.mxu1 %v4228_v35  ;;  %v4862_v35 = vld [vmem:[#allocation8 + $0x24c] ss:$16 sps:$4 sm:$0xff]  }
 0x173   : > { %1386 = vmatprep.subr.bf16.mxu1 %v4237_v36 }
 0x176   : > { %1387 = vmatpush1.bf16.msra.mxu1 %v4236_v39 }
 0x177   : > { %1388 = vmatprep.subr.bf16.mxu1 %v4245_v40  ;;  %v4865_v40 = vld [vmem:[#allocation8 + $0x264] ss:$16 sps:$4 sm:$0xff]  }
 0x17a   : > { %1389 = vmatpush1.bf16.msra.mxu1 %v4244_v41  ;;  %v4868_v41 = vld [vmem:[#allocation8 + $0x26c] ss:$16 sps:$4 sm:$0xff]  }
 0x17b   : > { %3137 = vmatprep.subr.bf16.mxu1 %v4754_v42 }
 0x17d   : > { %1391 = vmatmul.mubr.bf16.vlgmr.msra.gmra.mrb[8].mxu1 %v5839_v55  ;;  %v4790_v55 = vld [vmem:[#allocation8 + $0xcc] ss:$16 sps:$4 sm:$0xff]  }
 0x17e   : > { %3138 = vmatpush1.bf16.msra.mxu1 %v4752_v43 }
 0x17f   : > { %3139 = vmatprep.subr.bf16.mxu1 %v4760_v44  ;;  %v4863_v44 = vld [vmem:[#allocation8 + $0x260] ss:$16 sps:$4 sm:$0xff]  }
 0x182   : > { %3140 = vmatpush1.bf16.msra.mxu1 %v4758_v45  ;;  %v4866_v45 = vld [vmem:[#allocation8 + $0x268] ss:$16 sps:$4 sm:$0xff]  }
 0x183   : > { %3141 = vmatprep.subr.bf16.mxu1 %v4766_v46  ;;  %v4871_v46 = vld [vmem:[#allocation8 + $0x284] ss:$16 sps:$4 sm:$0xff]  }
 0x186   : > { %3142 = vmatpush1.bf16.msra.mxu1 %v4764_v47  ;;  %v4874_v47 = vld [vmem:[#allocation8 + $0x28c] ss:$16 sps:$4 sm:$0xff]  }
 0x187   : > { %3143 = vmatprep.subr.bf16.mxu1 %v4772_v48  ;;  %v4869_v48 = vld [vmem:[#allocation8 + $0x280] ss:$16 sps:$4 sm:$0xff]  }
 0x18a   : > { %3144 = vmatpush1.bf16.msra.mxu1 %v4770_v49  ;;  %v4872_v49 = vld [vmem:[#allocation8 + $0x288] ss:$16 sps:$4 sm:$0xff]  }
 0x18b   : > { %3145 = vmatprep.subr.bf16.mxu1 %v4778_v50  ;;  %v4877_v50 = vld [vmem:[#allocation8 + $0x2a4] ss:$16 sps:$4 sm:$0xff]  }
 0x18e   : > { %3146 = vmatpush1.bf16.msra.mxu1 %v4776_v51  ;;  %v4880_v51 = vld [vmem:[#allocation8 + $0x2ac] ss:$16 sps:$4 sm:$0xff]  }
 0x18f   : > { %3147 = vmatprep.subr.bf16.mxu1 %v4784_v52  ;;  %v4875_v52 = vld [vmem:[#allocation8 + $0x2a0] ss:$16 sps:$4 sm:$0xff]  }
 0x192   : > { %3148 = vmatpush1.bf16.msra.mxu1 %v4782_v53  ;;  %v4878_v53 = vld [vmem:[#allocation8 + $0x2a8] ss:$16 sps:$4 sm:$0xff]  }
 0x193   : > { %3149 = vmatprep.subr.bf16.mxu1 %v4790_v55  ;;  %v4883_v55 = vld [vmem:[#allocation8 + $0x2c4] ss:$16 sps:$4 sm:$0xff]  }
 0x196   : > { %3150 = vmatpush1.bf16.msra.mxu1 %v4788_v54  ;;  %v4886_v54 = vld [vmem:[#allocation8 + $0x2cc] ss:$16 sps:$4 sm:$0xff]  }
 0x197   : > { %3151 = vmatprep.subr.bf16.mxu1 %v4796_v56  ;;  %v4881_v56 = vld [vmem:[#allocation8 + $0x2c0] ss:$16 sps:$4 sm:$0xff]  }
 0x19a   : > { %3152 = vmatpush1.bf16.msra.mxu1 %v4794_v18  ;;  %v4884_v18 = vld [vmem:[#allocation8 + $0x2c8] ss:$16 sps:$4 sm:$0xff]  }
 0x19b   : > { %3153 = vmatprep.subr.bf16.mxu1 %v4802_v57  ;;  %v4889_v57 = vld [vmem:[#allocation8 + $0x2e4] ss:$16 sps:$4 sm:$0xff]  }
 0x19e   : > { %3154 = vmatpush1.bf16.msra.mxu1 %v4800_v58  ;;  %v4892_v58 = vld [vmem:[#allocation8 + $0x2ec] ss:$16 sps:$4 sm:$0xff]  }
 0x19f   : > { %3155 = vmatprep.subr.bf16.mxu1 %v4808_v59  ;;  %v4887_v59 = vld [vmem:[#allocation8 + $0x2e0] ss:$16 sps:$4 sm:$0xff]  }
 0x1a2   : > { %3156 = vmatpush1.bf16.msra.mxu1 %v4806_v60  ;;  %v4890_v60 = vld [vmem:[#allocation8 + $0x2e8] ss:$16 sps:$4 sm:$0xff]  }
 0x1a3   : > { %3157 = vmatprep.subr.bf16.mxu1 %v4814_v61  ;;  %v4895_v61 = vld [vmem:[#allocation8 + $0x304] ss:$16 sps:$4 sm:$0xff]  }
 0x1a6   : > { %3158 = vmatpush1.bf16.msra.mxu1 %v4812_v62  ;;  %v4898_v62 = vld [vmem:[#allocation8 + $0x30c] ss:$16 sps:$4 sm:$0xff]  }
 0x1a7   : > { %3159 = vmatprep.subr.bf16.mxu1 %v4820_v63  ;;  %v4893_v63 = vld [vmem:[#allocation8 + $0x300] ss:$16 sps:$4 sm:$0xff]  }
 0x1aa   : > { %3160 = vmatpush1.bf16.msra.mxu1 %v4818_v0  ;;  %v4896_v0 = vld [vmem:[#allocation8 + $0x308] ss:$16 sps:$4 sm:$0xff]  }
 0x1ab   : > { %3161 = vmatprep.subr.bf16.mxu1 %v4826_v1  ;;  %v4901_v1 = vld [vmem:[#allocation8 + $0x324] ss:$16 sps:$4 sm:$0xff]  }
 0x1ae   : > { %3162 = vmatpush1.bf16.msra.mxu1 %v4824_v2  ;;  %v4904_v2 = vld [vmem:[#allocation8 + $0x32c] ss:$16 sps:$4 sm:$0xff]  }
 0x1af   : > { %3163 = vmatprep.subr.bf16.mxu1 %v4832_v3  ;;  %v4899_v3 = vld [vmem:[#allocation8 + $0x320] ss:$16 sps:$4 sm:$0xff]  }
 0x1b2   : > { %3164 = vmatpush1.bf16.msra.mxu1 %v4830_v4  ;;  %v4902_v4 = vld [vmem:[#allocation8 + $0x328] ss:$16 sps:$4 sm:$0xff]  }
 0x1b3   : > { %3165 = vmatprep.subr.bf16.mxu1 %v4838_v5  ;;  %v4907_v5 = vld [vmem:[#allocation8 + $0x344] ss:$16 sps:$4 sm:$0xff]  }
 0x1b6   : > { %3166 = vmatpush1.bf16.msra.mxu1 %v4836_v6  ;;  %v4910_v6 = vld [vmem:[#allocation8 + $0x34c] ss:$16 sps:$4 sm:$0xff]  }
 0x1b7   : > { %3167 = vmatprep.subr.bf16.mxu1 %v4844_v7  ;;  %v577_v7 = vsub.s32 5, %v5847_v11 }
 0x1ba   : > { %3168 = vmatpush1.bf16.msra.mxu1 %v4842_v8  ;;  %v4905_v8 = vld [vmem:[#allocation8 + $0x340] ss:$16 sps:$4 sm:$0xff]  }
 0x1bb   : > { %3178 = vmatprep.subr.bf16.mxu1 %v4850_v9  ;;  %v4908_v9 = vld [vmem:[#allocation8 + $0x348] ss:$16 sps:$4 sm:$0xff]  }
 0x1d0   : > { %v1269_v17 = vpop.f32.mrb[0].mxu1  ;;  %v5861_v36 = vpop.f32.mrb[0].mxu0 }
 0x1d1   : > { %v1270_v19 = vadd.f32 %v1269_v17, %v558_v15  ;;  %v1271_v20 = vpop.f32.mrb[1].mxu1  ;;  %v5863_v39 = vpop.f32.mrb[1].mxu0  ;;  %v4916_v15 = vld [vmem:[#allocation8 + $0x36c] ss:$16 sps:$4 sm:$0xff]   ;;  %v569_v17 = vsub.s32 3, %v5847_v11 }
 0x1d2   : > { %v1272_v21 = vadd.f32 %v1271_v20, %v562_v16  ;;  %v1273_v22 = vpop.f32.mrb[2].mxu1  ;;  %v1355_v42 = vpop.f32.mrb[2].mxu0  ;;  %v565_v16 = vsub.s32 2, %v5847_v11  ;;  %v4911_v20 = vld [vmem:[#allocation8 + $0x360] ss:$16 sps:$4 sm:$0xff]  }
 0x1d3   : > { %5245 = vtanh.f32 %v1270_v19  ;;  %v1274_v23 = vpop.f32.mrb[3].mxu1  ;;  %v1356_v43 = vpop.f32.mrb[3].mxu0  ;;  %v578_v19 = vrot.slane %v5852_v13, %v577_v7  ;;  %v4919_v22 = vld [vmem:[#allocation8 + $0x384] ss:$16 sps:$4 sm:$0xff]   ;;  %v4929_v42 = vld [vmem:[#allocation8 + $0x3c0] ss:$16 sps:$4 sm:$0xff]  }
 0x1d4   : > { %5247 = vtanh.f32 %v1272_v21  ;;  %v4914_v21 = vld [vmem:[#allocation8 + $0x368] ss:$16 sps:$4 sm:$0xff]   ;;  %v4922_v23 = vld [vmem:[#allocation8 + $0x38c] ss:$16 sps:$4 sm:$0xff]   ;;  %v4965_v7 = vld [vmem:[#allocation8 + $0x480] ss:$16 sps:$4 sm:$0xff]  }
 0x1d5   : > { %v4932_v43 = vld [vmem:[#allocation8 + $0x3c8] ss:$16 sps:$4 sm:$0xff]  }
 0x1dd   : > { %v5246_v24 = vpop.eup %5245 }
 0x1de   : > { %v5248_v25 = vpop.eup %5247  ;;  %v1407_v29 = vpack.c.bf16 %v5246_v24, %v5246_v24  ;;  %v566_v24 = vrot.slane %v5852_v13, %v565_v16 }
 0x1df   : > { %v1408_v26 = vpack.c.bf16 %v5248_v25, %v5248_v25  ;;  %v570_v25 = vrot.slane %v5852_v13, %v569_v17 }
 0x1e1   : > { %3005 = vmatprep.mubr.bf16.mxu0 %v1408_v26  ;;  %3169 = vmatprep.mubr.bf16.mxu1 %v1408_v26  ;;  %v1354_v26 = vadd.f32 %v5863_v39, %v578_v19  ;;  %v4926_v39 = vld [vmem:[#allocation8 + $0x3a8] ss:$16 sps:$4 sm:$0xff]  }
 0x1e2   : > { %3006 = vmatmul.mubr.bf16.vlgmr.msra.gmra.mrb[4].mxu0 %v1407_v29  ;;  %3170 = vmatmul.mubr.bf16.vlgmr.msra.gmra.mrb[12].mxu1 %v1407_v29  ;;  %v4974_v19 = vld [vmem:[#allocation8 + $0x4a8] ss:$16 sps:$4 sm:$0xff]  }
 0x1e3   : > { %3015 = vmatpush1.bf16.msra.mxu0 %v4845_v27  ;;  %3179 = vmatpush1.bf16.msra.mxu1 %v4848_v28  ;;  %v4917_v27 = vld [vmem:[#allocation8 + $0x380] ss:$16 sps:$4 sm:$0xff]   ;;  %v4920_v28 = vld [vmem:[#allocation8 + $0x388] ss:$16 sps:$4 sm:$0xff]   ;;  %5249 = vtanh.f32 %v1354_v26 }
 0x1e4   : > { %3016 = vmatprep.subr.bf16.mxu0 %v4853_v30  ;;  %3180 = vmatprep.subr.bf16.mxu1 %v4856_v31  ;;  %v4925_v30 = vld [vmem:[#allocation8 + $0x3a4] ss:$16 sps:$4 sm:$0xff]   ;;  %v4928_v31 = vld [vmem:[#allocation8 + $0x3ac] ss:$16 sps:$4 sm:$0xff]   ;;  %v4983_v26 = vld [vmem:[#allocation8 + $0x4e0] ss:$16 sps:$4 sm:$0xff]  }
 0x1e7   : > { %3017 = vmatpush1.bf16.msra.mxu0 %v4851_v32  ;;  %3181 = vmatpush1.bf16.msra.mxu1 %v4854_v33 }
 0x1e8   : > { %3018 = vmatprep.subr.bf16.mxu0 %v4859_v34  ;;  %3182 = vmatprep.subr.bf16.mxu1 %v4862_v35 }
 0x1eb   : > { %3019 = vmatpush1.bf16.msra.mxu0 %v4857_v37  ;;  %3183 = vmatpush1.bf16.msra.mxu1 %v4860_v38  ;;  %v4923_v38 = vld [vmem:[#allocation8 + $0x3a0] ss:$16 sps:$4 sm:$0xff]  }
 0x1ec   : > { %3020 = vmatprep.subr.bf16.mxu0 %v4865_v40  ;;  %3184 = vmatprep.subr.bf16.mxu1 %v4868_v41  ;;  %v4931_v40 = vld [vmem:[#allocation8 + $0x3c4] ss:$16 sps:$4 sm:$0xff]   ;;  %v4934_v41 = vld [vmem:[#allocation8 + $0x3cc] ss:$16 sps:$4 sm:$0xff]  }
 0x1ef   : > { %3021 = vmatpush1.bf16.msra.mxu0 %v4863_v44  ;;  %3185 = vmatpush1.bf16.msra.mxu1 %v4866_v45  ;;  %v4937_v44 = vld [vmem:[#allocation8 + $0x3e4] ss:$16 sps:$4 sm:$0xff]   ;;  %v4940_v45 = vld [vmem:[#allocation8 + $0x3ec] ss:$16 sps:$4 sm:$0xff]  }
 0x1f0   : > { %3022 = vmatprep.subr.bf16.mxu0 %v4871_v46  ;;  %3186 = vmatprep.subr.bf16.mxu1 %v4874_v47  ;;  %v4935_v46 = vld [vmem:[#allocation8 + $0x3e0] ss:$16 sps:$4 sm:$0xff]   ;;  %v4938_v47 = vld [vmem:[#allocation8 + $0x3e8] ss:$16 sps:$4 sm:$0xff]  }
 0x1f3   : > { %3023 = vmatpush1.bf16.msra.mxu0 %v4869_v48  ;;  %3187 = vmatpush1.bf16.msra.mxu1 %v4872_v49  ;;  %v5250_v48 = vpop.eup %5249  ;;  %v4943_v49 = vld [vmem:[#allocation8 + $0x404] ss:$16 sps:$4 sm:$0xff]  }
 0x1f4   : > { %3024 = vmatprep.subr.bf16.mxu0 %v4877_v50  ;;  %3188 = vmatprep.subr.bf16.mxu1 %v4880_v51  ;;  %v4946_v50 = vld [vmem:[#allocation8 + $0x40c] ss:$16 sps:$4 sm:$0xff]  }
 0x1f7   : > { %3025 = vmatpush1.bf16.msra.mxu0 %v4875_v52  ;;  %3189 = vmatpush1.bf16.msra.mxu1 %v4878_v53 }
 0x1f8   : > { %3026 = vmatprep.subr.bf16.mxu0 %v4883_v55  ;;  %3190 = vmatprep.subr.bf16.mxu1 %v4886_v54  ;;  %v4941_v55 = vld [vmem:[#allocation8 + $0x400] ss:$16 sps:$4 sm:$0xff]   ;;  %v4944_v54 = vld [vmem:[#allocation8 + $0x408] ss:$16 sps:$4 sm:$0xff]  }
 0x1fb   : > { %3027 = vmatpush1.bf16.msra.mxu0 %v4881_v56  ;;  %3191 = vmatpush1.bf16.msra.mxu1 %v4884_v18  ;;  %v4949_v18 = vld [vmem:[#allocation8 + $0x424] ss:$16 sps:$4 sm:$0xff]  }
 0x1fc   : > { %3028 = vmatprep.subr.bf16.mxu0 %v4889_v57  ;;  %3192 = vmatprep.subr.bf16.mxu1 %v4892_v58  ;;  %v4952_v57 = vld [vmem:[#allocation8 + $0x42c] ss:$16 sps:$4 sm:$0xff]   ;;  %v1412_v58 = vpack.c.bf16 %v5250_v48, %v5250_v48  ;;  %v5015_v48 = vld [vmem:[#allocation8 + $0x584] ss:$16 sps:$4 sm:$0xff]  }
 0x1ff   : > { %3029 = vmatpush1.bf16.msra.mxu0 %v4887_v59  ;;  %3193 = vmatpush1.bf16.msra.mxu1 %v4890_v60  ;;  %v4947_v59 = vld [vmem:[#allocation8 + $0x420] ss:$16 sps:$4 sm:$0xff]   ;;  %v4950_v60 = vld [vmem:[#allocation8 + $0x428] ss:$16 sps:$4 sm:$0xff]  }
 0x200   : > { %3030 = vmatprep.subr.bf16.mxu0 %v4895_v61  ;;  %3194 = vmatprep.subr.bf16.mxu1 %v4898_v62  ;;  %v4955_v61 = vld [vmem:[#allocation8 + $0x444] ss:$16 sps:$4 sm:$0xff]   ;;  %v4958_v62 = vld [vmem:[#allocation8 + $0x44c] ss:$16 sps:$4 sm:$0xff]  }
 0x203   : > { %3031 = vmatpush1.bf16.msra.mxu0 %v4893_v63  ;;  %3195 = vmatpush1.bf16.msra.mxu1 %v4896_v0  ;;  %v4953_v63 = vld [vmem:[#allocation8 + $0x440] ss:$16 sps:$4 sm:$0xff]   ;;  %v4956_v0 = vld [vmem:[#allocation8 + $0x448] ss:$16 sps:$4 sm:$0xff]  }
 0x204   : > { %3032 = vmatprep.subr.bf16.mxu0 %v4901_v1  ;;  %3196 = vmatprep.subr.bf16.mxu1 %v4904_v2  ;;  %v4961_v1 = vld [vmem:[#allocation8 + $0x464] ss:$16 sps:$4 sm:$0xff]   ;;  %v4964_v2 = vld [vmem:[#allocation8 + $0x46c] ss:$16 sps:$4 sm:$0xff]  }
 0x207   : > { %3033 = vmatpush1.bf16.msra.mxu0 %v4899_v3  ;;  %3197 = vmatpush1.bf16.msra.mxu1 %v4902_v4  ;;  %v4959_v3 = vld [vmem:[#allocation8 + $0x460] ss:$16 sps:$4 sm:$0xff]   ;;  %v4962_v4 = vld [vmem:[#allocation8 + $0x468] ss:$16 sps:$4 sm:$0xff]  }
 0x208   : > { %3034 = vmatprep.subr.bf16.mxu0 %v4907_v5  ;;  %3198 = vmatprep.subr.bf16.mxu1 %v4910_v6  ;;  %v4967_v5 = vld [vmem:[#allocation8 + $0x484] ss:$16 sps:$4 sm:$0xff]   ;;  %v4970_v6 = vld [vmem:[#allocation8 + $0x48c] ss:$16 sps:$4 sm:$0xff]  }
 0x20b   : > { %3035 = vmatpush1.bf16.msra.mxu0 %v4905_v8  ;;  %3199 = vmatpush1.bf16.msra.mxu1 %v4908_v9  ;;  %v4968_v8 = vld [vmem:[#allocation8 + $0x488] ss:$16 sps:$4 sm:$0xff]   ;;  %v4973_v9 = vld [vmem:[#allocation8 + $0x4a4] ss:$16 sps:$4 sm:$0xff]  }
 0x20c   : > { %3036 = vmatprep.subr.bf16.mxu0 %v4913_v10  ;;  %3200 = vmatprep.subr.bf16.mxu1 %v4916_v15  ;;  %v4976_v10 = vld [vmem:[#allocation8 + $0x4ac] ss:$16 sps:$4 sm:$0xff]   ;;  %v4971_v15 = vld [vmem:[#allocation8 + $0x4a0] ss:$16 sps:$4 sm:$0xff]  }
 0x20f   : > { %3037 = vmatpush1.bf16.msra.mxu0 %v4911_v20  ;;  %3201 = vmatpush1.bf16.msra.mxu1 %v4914_v21  ;;  %v4979_v20 = vld [vmem:[#allocation8 + $0x4c4] ss:$16 sps:$4 sm:$0xff]   ;;  %v4982_v21 = vld [vmem:[#allocation8 + $0x4cc] ss:$16 sps:$4 sm:$0xff]  }
 0x210   : > { %v1310_v29 = vpop.f32.mrb[4].mxu1  ;;  %3038 = vmatprep.subr.bf16.mxu0 %v4919_v22  ;;  %3202 = vmatprep.subr.bf16.mxu1 %v4922_v23  ;;  %v4977_v22 = vld [vmem:[#allocation8 + $0x4c0] ss:$16 sps:$4 sm:$0xff]   ;;  %v4980_v23 = vld [vmem:[#allocation8 + $0x4c8] ss:$16 sps:$4 sm:$0xff]  }
 0x211   : > { %v1311_v32 = vadd.f32 %v1310_v29, %v566_v24  ;;  %v1312_v33 = vpop.f32.mrb[5].mxu1  ;;  %v4985_v24 = vld [vmem:[#allocation8 + $0x4e4] ss:$16 sps:$4 sm:$0xff]   ;;  %v4994_v29 = vld [vmem:[#allocation8 + $0x50c] ss:$16 sps:$4 sm:$0xff]  }
 0x212   : > { %v1313_v34 = vadd.f32 %v1312_v33, %v570_v25  ;;  %v1314_v35 = vpop.f32.mrb[6].mxu1  ;;  %v4988_v25 = vld [vmem:[#allocation8 + $0x4ec] ss:$16 sps:$4 sm:$0xff]  }
 0x213   : > { %5251 = vtanh.f32 %v1311_v32  ;;  %3039 = vmatpush1.bf16.msra.mxu0 %v4917_v27  ;;  %3203 = vmatpush1.bf16.msra.mxu1 %v4920_v28  ;;  %v1315_v37 = vpop.f32.mrb[7].mxu1  ;;  %v4986_v27 = vld [vmem:[#allocation8 + $0x4e8] ss:$16 sps:$4 sm:$0xff]   ;;  %v4991_v28 = vld [vmem:[#allocation8 + $0x504] ss:$16 sps:$4 sm:$0xff]  }
 0x214   : > { %5253 = vtanh.f32 %v1313_v34  ;;  %3040 = vmatprep.subr.bf16.mxu0 %v4925_v30  ;;  %3204 = vmatprep.subr.bf16.mxu1 %v4928_v31  ;;  %v4989_v30 = vld [vmem:[#allocation8 + $0x500] ss:$16 sps:$4 sm:$0xff]   ;;  %v4992_v31 = vld [vmem:[#allocation8 + $0x508] ss:$16 sps:$4 sm:$0xff]   ;;  %v4997_v32 = vld [vmem:[#allocation8 + $0x524] ss:$16 sps:$4 sm:$0xff]  }
 0x215   : > { %v5000_v33 = vld [vmem:[#allocation8 + $0x52c] ss:$16 sps:$4 sm:$0xff]   ;;  %v4995_v34 = vld [vmem:[#allocation8 + $0x520] ss:$16 sps:$4 sm:$0xff]   ;;  %v4998_v35 = vld [vmem:[#allocation8 + $0x528] ss:$16 sps:$4 sm:$0xff]  }
 0x216   : > { %v5003_v37 = vld [vmem:[#allocation8 + $0x544] ss:$16 sps:$4 sm:$0xff]  }
 0x217   : > { %3041 = vmatpush1.bf16.msra.mxu0 %v4923_v38  ;;  %3205 = vmatpush1.bf16.msra.mxu1 %v4926_v39  ;;  %v5006_v38 = vld [vmem:[#allocation8 + $0x54c] ss:$16 sps:$4 sm:$0xff]   ;;  %v573_v39 = vsub.s32 4, %v5847_v11 }
 0x218   : > { %3042 = vmatprep.subr.bf16.mxu0 %v4931_v40  ;;  %3206 = vmatprep.subr.bf16.mxu1 %v4934_v41  ;;  %v5001_v40 = vld [vmem:[#allocation8 + $0x540] ss:$16 sps:$4 sm:$0xff]   ;;  %v5004_v41 = vld [vmem:[#allocation8 + $0x548] ss:$16 sps:$4 sm:$0xff]  }
 0x21b   : > { %3043 = vmatpush1.bf16.msra.mxu0 %v4929_v42  ;;  %3207 = vmatpush1.bf16.msra.mxu1 %v4932_v43  ;;  %v5009_v42 = vld [vmem:[#allocation8 + $0x564] ss:$16 sps:$4 sm:$0xff]   ;;  %v5012_v43 = vld [vmem:[#allocation8 + $0x56c] ss:$16 sps:$4 sm:$0xff]  }
 0x21c   : > { %3044 = vmatprep.subr.bf16.mxu0 %v4937_v44  ;;  %3208 = vmatprep.subr.bf16.mxu1 %v4940_v45  ;;  %v574_v44 = vrot.slane %v5852_v13, %v573_v39  ;;  %v585_v45 = vsub.s32 7, %v5847_v11  ;;  %v5067_v39 = vld [vmem:[#allocation8 + $0x6a0] ss:$16 sps:$4 sm:$0xff]  }
 0x21d   : > { %v5252_v51 = vpop.eup %5251 }
 0x21e   : > { %v5254_v52 = vpop.eup %5253  ;;  %v1409_v56 = vpack.c.bf16 %v5252_v51, %v5252_v51  ;;  %v586_v51 = vrot.slane %v5852_v13, %v585_v45  ;;  %v5081_v45 = vld [vmem:[#allocation8 + $0x6e4] ss:$16 sps:$4 sm:$0xff]  }
 0x21f   : > { %v1410_v53 = vpack.c.bf16 %v5254_v52, %v5254_v52  ;;  %3045 = vmatpush1.bf16.msra.mxu0 %v4935_v46  ;;  %3209 = vmatpush1.bf16.msra.mxu1 %v4938_v47  ;;  %v5007_v46 = vld [vmem:[#allocation8 + $0x560] ss:$16 sps:$4 sm:$0xff]   ;;  %v5010_v47 = vld [vmem:[#allocation8 + $0x568] ss:$16 sps:$4 sm:$0xff]  }
 0x220   : > { %3055 = vmatprep.subr.bf16.mxu0 %v4943_v49  ;;  %3219 = vmatprep.subr.bf16.mxu1 %v4946_v50  ;;  %v5018_v49 = vld [vmem:[#allocation8 + $0x58c] ss:$16 sps:$4 sm:$0xff]   ;;  %v1352_v50 = vadd.f32 %v5861_v36, %v574_v44  ;;  %v5013_v52 = vld [vmem:[#allocation8 + $0x580] ss:$16 sps:$4 sm:$0xff]   ;;  %v5022_v36 = vld [vmem:[#allocation8 + $0x5a8] ss:$16 sps:$4 sm:$0xff]  }
 0x221   : > { %3046 = vmatprep.mubr.bf16.mxu0 %v1410_v53  ;;  %3210 = vmatprep.mubr.bf16.mxu1 %v1410_v53  ;;  %v5016_v53 = vld [vmem:[#allocation8 + $0x588] ss:$16 sps:$4 sm:$0xff]  }
 0x222   : > { %3047 = vmatmul.mubr.bf16.vlgmr.msra.gmra.mrb[4].mxu0 %v1409_v56  ;;  %3211 = vmatmul.mubr.bf16.vlgmr.msra.gmra.mrb[12].mxu1 %v1409_v56  ;;  %5255 = vtanh.f32 %v1352_v50  ;;  %v5076_v44 = vld [vmem:[#allocation8 + $0x6c8] ss:$16 sps:$4 sm:$0xff]   ;;  %v5090_v50 = vld [vmem:[#allocation8 + $0x70c] ss:$16 sps:$4 sm:$0xff]  }
 0x223   : > { %3056 = vmatpush1.bf16.msra.mxu0 %v4941_v55  ;;  %3220 = vmatpush1.bf16.msra.mxu1 %v4944_v54  ;;  %v5021_v55 = vld [vmem:[#allocation8 + $0x5a4] ss:$16 sps:$4 sm:$0xff]   ;;  %v5024_v54 = vld [vmem:[#allocation8 + $0x5ac] ss:$16 sps:$4 sm:$0xff]  }
 0x224   : > { %3057 = vmatprep.subr.bf16.mxu0 %v4949_v18  ;;  %3221 = vmatprep.subr.bf16.mxu1 %v4952_v57 }
 0x225   : > { %3087 = vmatprep.mubr.bf16.mxu0 %v1412_v58  ;;  %3251 = vmatprep.mubr.bf16.mxu1 %v1412_v58 }
 0x227   : > { %3058 = vmatpush1.bf16.msra.mxu0 %v4947_v59  ;;  %3222 = vmatpush1.bf16.msra.mxu1 %v4950_v60  ;;  %v5019_v59 = vld [vmem:[#allocation8 + $0x5a0] ss:$16 sps:$4 sm:$0xff]  }
 0x228   : > { %3059 = vmatprep.subr.bf16.mxu0 %v4955_v61  ;;  %3223 = vmatprep.subr.bf16.mxu1 %v4958_v62  ;;  %v5027_v61 = vld [vmem:[#allocation8 + $0x5c4] ss:$16 sps:$4 sm:$0xff]   ;;  %v5030_v62 = vld [vmem:[#allocation8 + $0x5cc] ss:$16 sps:$4 sm:$0xff]  }
 0x22b   : > { %3060 = vmatpush1.bf16.msra.mxu0 %v4953_v63  ;;  %3224 = vmatpush1.bf16.msra.mxu1 %v4956_v0  ;;  %v5025_v63 = vld [vmem:[#allocation8 + $0x5c0] ss:$16 sps:$4 sm:$0xff]   ;;  %v5028_v0 = vld [vmem:[#allocation8 + $0x5c8] ss:$16 sps:$4 sm:$0xff]  }
 0x22c   : > { %3061 = vmatprep.subr.bf16.mxu0 %v4961_v1  ;;  %3225 = vmatprep.subr.bf16.mxu1 %v4964_v2  ;;  %v5033_v1 = vld [vmem:[#allocation8 + $0x5e4] ss:$16 sps:$4 sm:$0xff]   ;;  %v5036_v2 = vld [vmem:[#allocation8 + $0x5ec] ss:$16 sps:$4 sm:$0xff]  }
 0x22f   : > { %3062 = vmatpush1.bf16.msra.mxu0 %v4959_v3  ;;  %3226 = vmatpush1.bf16.msra.mxu1 %v4962_v4  ;;  %v5256_v3 = vpop.eup %5255  ;;  %v5031_v4 = vld [vmem:[#allocation8 + $0x5e0] ss:$16 sps:$4 sm:$0xff]  }
 0x230   : > { %3063 = vmatprep.subr.bf16.mxu0 %v4967_v5  ;;  %3227 = vmatprep.subr.bf16.mxu1 %v4970_v6  ;;  %v5034_v5 = vld [vmem:[#allocation8 + $0x5e8] ss:$16 sps:$4 sm:$0xff]   ;;  %v5039_v6 = vld [vmem:[#allocation8 + $0x604] ss:$16 sps:$4 sm:$0xff]  }
 0x233   : > { %3064 = vmatpush1.bf16.msra.mxu0 %v4965_v7  ;;  %3228 = vmatpush1.bf16.msra.mxu1 %v4968_v8  ;;  %v5042_v7 = vld [vmem:[#allocation8 + $0x60c] ss:$16 sps:$4 sm:$0xff]  }
 0x234   : > { %3065 = vmatprep.subr.bf16.mxu0 %v4973_v9  ;;  %3229 = vmatprep.subr.bf16.mxu1 %v4976_v10  ;;  %v1411_v9 = vpack.c.bf16 %v5256_v3, %v5256_v3  ;;  %v5037_v10 = vld [vmem:[#allocation8 + $0x600] ss:$16 sps:$4 sm:$0xff]   ;;  %v5114_v3 = vld [vmem:[#allocation8 + $0x78c] ss:$16 sps:$4 sm:$0xff]  }
 0x237   : > { %3066 = vmatpush1.bf16.msra.mxu0 %v4971_v15  ;;  %3230 = vmatpush1.bf16.msra.mxu1 %v4974_v19  ;;  %v5040_v15 = vld [vmem:[#allocation8 + $0x608] ss:$16 sps:$4 sm:$0xff]   ;;  %v5045_v19 = vld [vmem:[#allocation8 + $0x624] ss:$16 sps:$4 sm:$0xff]  }
 0x238   : > { %3067 = vmatprep.subr.bf16.mxu0 %v4979_v20  ;;  %3231 = vmatprep.subr.bf16.mxu1 %v4982_v21  ;;  %v5048_v20 = vld [vmem:[#allocation8 + $0x62c] ss:$16 sps:$4 sm:$0xff]  }
 0x23b   : > { %3068 = vmatpush1.bf16.msra.mxu0 %v4977_v22  ;;  %3232 = vmatpush1.bf16.msra.mxu1 %v4980_v23  ;;  %v5043_v22 = vld [vmem:[#allocation8 + $0x620] ss:$16 sps:$4 sm:$0xff]   ;;  %v5046_v23 = vld [vmem:[#allocation8 + $0x628] ss:$16 sps:$4 sm:$0xff]  }
 0x23c   : > { %3069 = vmatprep.subr.bf16.mxu0 %v4985_v24  ;;  %3233 = vmatprep.subr.bf16.mxu1 %v4988_v25  ;;  %v5051_v24 = vld [vmem:[#allocation8 + $0x644] ss:$16 sps:$4 sm:$0xff]   ;;  %v5054_v25 = vld [vmem:[#allocation8 + $0x64c] ss:$16 sps:$4 sm:$0xff]  }
 0x23f   : > { %3070 = vmatpush1.bf16.msra.mxu0 %v4983_v26  ;;  %3234 = vmatpush1.bf16.msra.mxu1 %v4986_v27  ;;  %v5049_v26 = vld [vmem:[#allocation8 + $0x640] ss:$16 sps:$4 sm:$0xff]   ;;  %v5052_v27 = vld [vmem:[#allocation8 + $0x648] ss:$16 sps:$4 sm:$0xff]  }
 0x240   : > { %3071 = vmatprep.subr.bf16.mxu0 %v4991_v28  ;;  %3235 = vmatprep.subr.bf16.mxu1 %v4994_v29  ;;  %v5057_v28 = vld [vmem:[#allocation8 + $0x664] ss:$16 sps:$4 sm:$0xff]   ;;  %v5060_v29 = vld [vmem:[#allocation8 + $0x66c] ss:$16 sps:$4 sm:$0xff]  }
 0x243   : > { %3072 = vmatpush1.bf16.msra.mxu0 %v4989_v30  ;;  %3236 = vmatpush1.bf16.msra.mxu1 %v4992_v31  ;;  %v5055_v30 = vld [vmem:[#allocation8 + $0x660] ss:$16 sps:$4 sm:$0xff]   ;;  %v5058_v31 = vld [vmem:[#allocation8 + $0x668] ss:$16 sps:$4 sm:$0xff]  }
 0x244   : > { %3073 = vmatprep.subr.bf16.mxu0 %v4997_v32  ;;  %3237 = vmatprep.subr.bf16.mxu1 %v5000_v33  ;;  %v5063_v32 = vld [vmem:[#allocation8 + $0x684] ss:$16 sps:$4 sm:$0xff]   ;;  %v5066_v33 = vld [vmem:[#allocation8 + $0x68c] ss:$16 sps:$4 sm:$0xff]  }
 0x247   : > { %3074 = vmatpush1.bf16.msra.mxu0 %v4995_v34  ;;  %3238 = vmatpush1.bf16.msra.mxu1 %v4998_v35  ;;  %v5061_v34 = vld [vmem:[#allocation8 + $0x680] ss:$16 sps:$4 sm:$0xff]   ;;  %v5064_v35 = vld [vmem:[#allocation8 + $0x688] ss:$16 sps:$4 sm:$0xff]  }
 0x248   : > { %3075 = vmatprep.subr.bf16.mxu0 %v5003_v37  ;;  %3239 = vmatprep.subr.bf16.mxu1 %v5006_v38  ;;  %v5069_v37 = vld [vmem:[#allocation8 + $0x6a4] ss:$16 sps:$4 sm:$0xff]   ;;  %v5072_v38 = vld [vmem:[#allocation8 + $0x6ac] ss:$16 sps:$4 sm:$0xff]  }
 0x24b   : > { %3076 = vmatpush1.bf16.msra.mxu0 %v5001_v40  ;;  %3240 = vmatpush1.bf16.msra.mxu1 %v5004_v41  ;;  %v5070_v40 = vld [vmem:[#allocation8 + $0x6a8] ss:$16 sps:$4 sm:$0xff]   ;;  %v5075_v41 = vld [vmem:[#allocation8 + $0x6c4] ss:$16 sps:$4 sm:$0xff]  }
 0x24c   : > { %3077 = vmatprep.subr.bf16.mxu0 %v5009_v42  ;;  %3241 = vmatprep.subr.bf16.mxu1 %v5012_v43  ;;  %v5078_v42 = vld [vmem:[#allocation8 + $0x6cc] ss:$16 sps:$4 sm:$0xff]   ;;  %v5073_v43 = vld [vmem:[#allocation8 + $0x6c0] ss:$16 sps:$4 sm:$0xff]  }
 0x24f   : > { %3078 = vmatpush1.bf16.msra.mxu0 %v5007_v46  ;;  %3242 = vmatpush1.bf16.msra.mxu1 %v5010_v47  ;;  %v5084_v46 = vld [vmem:[#allocation8 + $0x6ec] ss:$16 sps:$4 sm:$0xff]   ;;  %v5079_v47 = vld [vmem:[#allocation8 + $0x6e0] ss:$16 sps:$4 sm:$0xff]  }
 0x250   : > { %3079 = vmatprep.subr.bf16.mxu0 %v5015_v48  ;;  %3243 = vmatprep.subr.bf16.mxu1 %v5018_v49  ;;  %v5881_v56 = vpop.f32.mrb[8].mxu1  ;;  %v5082_v48 = vld [vmem:[#allocation8 + $0x6e8] ss:$16 sps:$4 sm:$0xff]   ;;  %v5087_v49 = vld [vmem:[#allocation8 + $0x704] ss:$16 sps:$4 sm:$0xff]  }
 0x251   : > { %v1394_v18 = vpop.f32.mrb[9].mxu1 }
 0x252   : > { %v1395_v57 = vadd.f32 %v1394_v18, %v586_v51  ;;  %v1396_v58 = vpop.f32.mrb[10].mxu1  ;;  %v5085_v51 = vld [vmem:[#allocation8 + $0x700] ss:$16 sps:$4 sm:$0xff]   ;;  %v5094_v18 = vld [vmem:[#allocation8 + $0x728] ss:$16 sps:$4 sm:$0xff]  }
 0x253   : > { %3080 = vmatpush1.bf16.msra.mxu0 %v5013_v52  ;;  %3244 = vmatpush1.bf16.msra.mxu1 %v5016_v53  ;;  %v1397_v60 = vpop.f32.mrb[11].mxu1  ;;  %v5088_v52 = vld [vmem:[#allocation8 + $0x708] ss:$16 sps:$4 sm:$0xff]   ;;  %v5093_v53 = vld [vmem:[#allocation8 + $0x724] ss:$16 sps:$4 sm:$0xff]  }
 0x254   : > { %3081 = vmatprep.subr.bf16.mxu0 %v5021_v55  ;;  %3245 = vmatprep.subr.bf16.mxu1 %v5024_v54  ;;  %5257 = vtanh.f32 %v1395_v57  ;;  %v5096_v55 = vld [vmem:[#allocation8 + $0x72c] ss:$16 sps:$4 sm:$0xff]   ;;  %v5091_v54 = vld [vmem:[#allocation8 + $0x720] ss:$16 sps:$4 sm:$0xff]   ;;  %v5099_v57 = vld [vmem:[#allocation8 + $0x744] ss:$16 sps:$4 sm:$0xff]  }
 0x255   : > { %v5102_v58 = vld [vmem:[#allocation8 + $0x74c] ss:$16 sps:$4 sm:$0xff]   ;;  %v581_v60 = vsub.s32 6, %v5847_v11 }
 0x256   : > { %v5228_v11 = vld [vmem:[#allocation10 + $0x1f4] ss:$8 sps:$4 sm:$0xff]  }
 0x257   : > { %3082 = vmatpush1.bf16.msra.mxu0 %v5019_v59  ;;  %3246 = vmatpush1.bf16.msra.mxu1 %v5022_v36  ;;  %v5097_v59 = vld [vmem:[#allocation8 + $0x740] ss:$16 sps:$4 sm:$0xff]   ;;  %v5100_v36 = vld [vmem:[#allocation8 + $0x748] ss:$16 sps:$4 sm:$0xff]  }
 0x258   : > { %3083 = vmatprep.subr.bf16.mxu0 %v5027_v61  ;;  %3247 = vmatprep.subr.bf16.mxu1 %v5030_v62  ;;  %v5105_v61 = vld [vmem:[#allocation8 + $0x764] ss:$16 sps:$4 sm:$0xff]   ;;  %v5108_v62 = vld [vmem:[#allocation8 + $0x76c] ss:$16 sps:$4 sm:$0xff]  }
 0x25b   : > { %3084 = vmatpush1.bf16.msra.mxu0 %v5025_v63  ;;  %3248 = vmatpush1.bf16.msra.mxu1 %v5028_v0  ;;  %v582_v63 = vrot.slane %v5852_v13, %v581_v60  ;;  %v5103_v0 = vld [vmem:[#allocation8 + $0x760] ss:$16 sps:$4 sm:$0xff]  }
 0x25c   : > { %3085 = vmatprep.subr.bf16.mxu0 %v5033_v1  ;;  %3249 = vmatprep.subr.bf16.mxu1 %v5036_v2  ;;  %v5106_v1 = vld [vmem:[#allocation8 + $0x768] ss:$16 sps:$4 sm:$0xff]   ;;  %v5111_v2 = vld [vmem:[#allocation8 + $0x784] ss:$16 sps:$4 sm:$0xff]   ;;  %v5115_v13 = vld [vmem:[#allocation8 + $0x7a0] ss:$16 sps:$4 sm:$0xff]  }
 0x25d   : > { %v5230_v60 = vld [vmem:[#allocation11] sm:$0xff]  }
 0x25e   : > { %v5258_v8 = vpop.eup %5257 }
 0x25f   : > { %3086 = vmatpush1.bf16.msra.mxu0 %v5031_v4  ;;  %3250 = vmatpush1.bf16.msra.mxu1 %v5034_v5  ;;  %v1414_v21 = vpack.c.bf16 %v5258_v8, %v5258_v8  ;;  %v1393_v4 = vadd.f32 %v5881_v56, %v582_v63  ;;  %v5109_v5 = vld [vmem:[#allocation8 + $0x780] ss:$16 sps:$4 sm:$0xff]   ;;  %v5120_v8 = vld [vmem:[#allocation8 + $0x7ac] ss:$16 sps:$4 sm:$0xff]  }
 0x260   : > { %3096 = vmatprep.subr.bf16.mxu0 %v5039_v6  ;;  %3260 = vmatprep.subr.bf16.mxu1 %v5042_v7  ;;  %v5112_v6 = vld [vmem:[#allocation8 + $0x788] ss:$16 sps:$4 sm:$0xff]   ;;  %v5117_v7 = vld [vmem:[#allocation8 + $0x7a4] ss:$16 sps:$4 sm:$0xff]   ;;  %v5121_v56 = vld [vmem:[#allocation8 + $0x7c0] ss:$16 sps:$4 sm:$0xff]  }
 0x261   : > { %5259 = vtanh.f32 %v1393_v4  ;;  %v5233_v63 = vld [vmem:[#allocation11 + $0x50] sm:$0xff]  }
 0x262   : > { %3088 = vmatmul.mubr.bf16.vlgmr.msra.gmra.mrb[4].mxu0 %v1411_v9  ;;  %3252 = vmatmul.mubr.bf16.vlgmr.msra.gmra.mrb[12].mxu1 %v1411_v9  ;;  %v5118_v9 = vld [vmem:[#allocation8 + $0x7a8] ss:$16 sps:$4 sm:$0xff]  }
 0x263   : > { %3097 = vmatpush1.bf16.msra.mxu0 %v5037_v10  ;;  %3261 = vmatpush1.bf16.msra.mxu1 %v5040_v15  ;;  %v5123_v10 = vld [vmem:[#allocation8 + $0x7c4] ss:$16 sps:$4 sm:$0xff]   ;;  %v5126_v15 = vld [vmem:[#allocation8 + $0x7cc] ss:$16 sps:$4 sm:$0xff]  }
 0x264   : > { %3098 = vmatprep.subr.bf16.mxu0 %v5045_v19  ;;  %3262 = vmatprep.subr.bf16.mxu1 %v5048_v20  ;;  %v5124_v19 = vld [vmem:[#allocation8 + $0x7c8] ss:$16 sps:$4 sm:$0xff]   ;;  %v5129_v20 = vld [vmem:[#allocation8 + $0x7e4] ss:$16 sps:$4 sm:$0xff]  }
 0x265   : > { %3128 = vmatprep.mubr.bf16.mxu0 %v1414_v21  ;;  %3292 = vmatprep.mubr.bf16.mxu1 %v1414_v21  ;;  %v5132_v21 = vld [vmem:[#allocation8 + $0x7ec] ss:$16 sps:$4 sm:$0xff]  }
 0x267   : > { %3099 = vmatpush1.bf16.msra.mxu0 %v5043_v22  ;;  %3263 = vmatpush1.bf16.msra.mxu1 %v5046_v23  ;;  %v5127_v22 = vld [vmem:[#allocation8 + $0x7e0] ss:$16 sps:$4 sm:$0xff]   ;;  %v5130_v23 = vld [vmem:[#allocation8 + $0x7e8] ss:$16 sps:$4 sm:$0xff]  }
 0x268   : > { %3100 = vmatprep.subr.bf16.mxu0 %v5051_v24  ;;  %3264 = vmatprep.subr.bf16.mxu1 %v5054_v25  ;;  %v5135_v24 = vld [vmem:[#allocation10 + $0x4] ss:$8 sps:$4 sm:$0xff]  }
 0x26b   : > { %3101 = vmatpush1.bf16.msra.mxu0 %v5049_v26  ;;  %3265 = vmatpush1.bf16.msra.mxu1 %v5052_v27  ;;  %v5260_v25 = vpop.eup %5259  ;;  %v5133_v26 = vld [vmem:[#allocation10] ss:$8 sps:$4 sm:$0xff]  }
 0x26c   : > { %3102 = vmatprep.subr.bf16.mxu0 %v5057_v28  ;;  %3266 = vmatprep.subr.bf16.mxu1 %v5060_v29  ;;  %v1413_v27 = vpack.c.bf16 %v5260_v25, %v5260_v25  ;;  %v5138_v28 = vld [vmem:[#allocation10 + $0x14] ss:$8 sps:$4 sm:$0xff]   ;;  %v5136_v29 = vld [vmem:[#allocation10 + $0x10] ss:$8 sps:$4 sm:$0xff]  }
 0x26f   : > { %3103 = vmatpush1.bf16.msra.mxu0 %v5055_v30  ;;  %3267 = vmatpush1.bf16.msra.mxu1 %v5058_v31  ;;  %v5141_v30 = vld [vmem:[#allocation10 + $0x24] ss:$8 sps:$4 sm:$0xff]   ;;  %v5139_v31 = vld [vmem:[#allocation10 + $0x20] ss:$8 sps:$4 sm:$0xff]  }
 0x270   : > { %3104 = vmatprep.subr.bf16.mxu0 %v5063_v32  ;;  %3268 = vmatprep.subr.bf16.mxu1 %v5066_v33  ;;  %v5144_v32 = vld [vmem:[#allocation10 + $0x34] ss:$8 sps:$4 sm:$0xff]   ;;  %v5142_v33 = vld [vmem:[#allocation10 + $0x30] ss:$8 sps:$4 sm:$0xff]  }
 0x273   : > { %3105 = vmatpush1.bf16.msra.mxu0 %v5061_v34  ;;  %3269 = vmatpush1.bf16.msra.mxu1 %v5064_v35  ;;  %v5147_v34 = vld [vmem:[#allocation10 + $0x44] ss:$8 sps:$4 sm:$0xff]   ;;  %v5145_v35 = vld [vmem:[#allocation10 + $0x40] ss:$8 sps:$4 sm:$0xff]  }
 0x274   : > { %3106 = vmatprep.subr.bf16.mxu0 %v5069_v37  ;;  %3270 = vmatprep.subr.bf16.mxu1 %v5072_v38  ;;  %v5150_v37 = vld [vmem:[#allocation10 + $0x54] ss:$8 sps:$4 sm:$0xff]   ;;  %v5148_v38 = vld [vmem:[#allocation10 + $0x50] ss:$8 sps:$4 sm:$0xff]  }
 0x277   : > { %3107 = vmatpush1.bf16.msra.mxu0 %v5067_v39  ;;  %3271 = vmatpush1.bf16.msra.mxu1 %v5070_v40  ;;  %v5153_v39 = vld [vmem:[#allocation10 + $0x64] ss:$8 sps:$4 sm:$0xff]   ;;  %v5151_v40 = vld [vmem:[#allocation10 + $0x60] ss:$8 sps:$4 sm:$0xff]  }
 0x278   : > { %3108 = vmatprep.subr.bf16.mxu0 %v5075_v41  ;;  %3272 = vmatprep.subr.bf16.mxu1 %v5078_v42  ;;  %v5156_v41 = vld [vmem:[#allocation10 + $0x74] ss:$8 sps:$4 sm:$0xff]   ;;  %v5154_v42 = vld [vmem:[#allocation10 + $0x70] ss:$8 sps:$4 sm:$0xff]  }
 0x27b   : > { %3109 = vmatpush1.bf16.msra.mxu0 %v5073_v43  ;;  %3273 = vmatpush1.bf16.msra.mxu1 %v5076_v44  ;;  %v5159_v43 = vld [vmem:[#allocation10 + $0x84] ss:$8 sps:$4 sm:$0xff]   ;;  %v5157_v44 = vld [vmem:[#allocation10 + $0x80] ss:$8 sps:$4 sm:$0xff]  }
 0x27c   : > { %3110 = vmatprep.subr.bf16.mxu0 %v5081_v45  ;;  %3274 = vmatprep.subr.bf16.mxu1 %v5084_v46  ;;  %v5162_v45 = vld [vmem:[#allocation10 + $0x94] ss:$8 sps:$4 sm:$0xff]   ;;  %v5160_v46 = vld [vmem:[#allocation10 + $0x90] ss:$8 sps:$4 sm:$0xff]  }
 0x27f   : > { %3111 = vmatpush1.bf16.msra.mxu0 %v5079_v47  ;;  %3275 = vmatpush1.bf16.msra.mxu1 %v5082_v48  ;;  %v5165_v47 = vld [vmem:[#allocation10 + $0xa4] ss:$8 sps:$4 sm:$0xff]   ;;  %v5163_v48 = vld [vmem:[#allocation10 + $0xa0] ss:$8 sps:$4 sm:$0xff]  }
 0x280   : > { %3112 = vmatprep.subr.bf16.mxu0 %v5087_v49  ;;  %3276 = vmatprep.subr.bf16.mxu1 %v5090_v50  ;;  %v5168_v49 = vld [vmem:[#allocation10 + $0xb4] ss:$8 sps:$4 sm:$0xff]   ;;  %v5166_v50 = vld [vmem:[#allocation10 + $0xb0] ss:$8 sps:$4 sm:$0xff]  }
 0x283   : > { %3113 = vmatpush1.bf16.msra.mxu0 %v5085_v51  ;;  %3277 = vmatpush1.bf16.msra.mxu1 %v5088_v52  ;;  %v5171_v51 = vld [vmem:[#allocation10 + $0xc4] ss:$8 sps:$4 sm:$0xff]   ;;  %v5169_v52 = vld [vmem:[#allocation10 + $0xc0] ss:$8 sps:$4 sm:$0xff]  }
 0x284   : > { %3114 = vmatprep.subr.bf16.mxu0 %v5093_v53  ;;  %3278 = vmatprep.subr.bf16.mxu1 %v5096_v55  ;;  %v5174_v53 = vld [vmem:[#allocation10 + $0xd4] ss:$8 sps:$4 sm:$0xff]   ;;  %v5172_v55 = vld [vmem:[#allocation10 + $0xd0] ss:$8 sps:$4 sm:$0xff]  }
 0x287   : > { %3115 = vmatpush1.bf16.msra.mxu0 %v5091_v54  ;;  %3279 = vmatpush1.bf16.msra.mxu1 %v5094_v18  ;;  %v5177_v54 = vld [vmem:[#allocation10 + $0xe4] ss:$8 sps:$4 sm:$0xff]   ;;  %v5175_v18 = vld [vmem:[#allocation10 + $0xe0] ss:$8 sps:$4 sm:$0xff]  }
 0x288   : > { %3116 = vmatprep.subr.bf16.mxu0 %v5099_v57  ;;  %3280 = vmatprep.subr.bf16.mxu1 %v5102_v58  ;;  %v5180_v57 = vld [vmem:[#allocation10 + $0xf4] ss:$8 sps:$4 sm:$0xff]   ;;  %v5178_v58 = vld [vmem:[#allocation10 + $0xf0] ss:$8 sps:$4 sm:$0xff]  }
 0x28b   : > { %3117 = vmatpush1.bf16.msra.mxu0 %v5097_v59  ;;  %3281 = vmatpush1.bf16.msra.mxu1 %v5100_v36  ;;  %v5183_v59 = vld [vmem:[#allocation10 + $0x104] ss:$8 sps:$4 sm:$0xff]  }
 0x28c   : > { %3118 = vmatprep.subr.bf16.mxu0 %v5105_v61  ;;  %3282 = vmatprep.subr.bf16.mxu1 %v5108_v62  ;;  %v5229_v36 = vld [vmem:[#allocation11 + $0x40] sm:$0xff]   ;;  %v5231_v61 = vld [vmem:[#allocation11 + $0x48] sm:$0xff]  }
 0x28d   : > { %v5232_v62 = vld [vmem:[#allocation11 + $0x8] sm:$0xff]  }
 0x28f   : > { %3119 = vmatpush1.bf16.msra.mxu0 %v5103_v0  ;;  %3283 = vmatpush1.bf16.msra.mxu1 %v5106_v1  ;;  %v5234_v0 = vld [vmem:[#allocation11 + $0x10] sm:$0xff]   ;;  %v5235_v1 = vld [vmem:[#allocation11 + $0x58] sm:$0xff]  }
 0x290   : > { %3120 = vmatprep.subr.bf16.mxu0 %v5111_v2  ;;  %3284 = vmatprep.subr.bf16.mxu1 %v5114_v3  ;;  %v5236_v2 = vld [vmem:[#allocation11 + $0x18] sm:$0xff]  }
 0x291   : > { %v5889_v3 = vld [vmem:[%s5964_s4] sm:$0xf] }
 0x292   : > { %v1676_v4 = vrot.slane %v5889_v3, %v5850_v12 }
 0x293   : > { %3121 = vmatpush1.bf16.msra.mxu0 %v5109_v5  ;;  %3285 = vmatpush1.bf16.msra.mxu1 %v5112_v6  ;;  %v1680_v5 = vrot.slane %v5889_v3, %v5855_v14  ;;  %v1688_v6 = vrot.slane %v5889_v3, %v569_v17  ;;  %v5181_v17 = vld [vmem:[#allocation10 + $0x100] ss:$8 sps:$4 sm:$0xff]  }
 0x294   : > { %3122 = vmatprep.subr.bf16.mxu0 %v5117_v7  ;;  %3286 = vmatprep.subr.bf16.mxu1 %v5120_v8 }
 0x297   : > { %3123 = vmatpush1.bf16.msra.mxu0 %v5115_v13  ;;  %3287 = vmatpush1.bf16.msra.mxu1 %v5118_v9 }
 0x298   : > { %3124 = vmatprep.subr.bf16.mxu0 %v5123_v10  ;;  %3288 = vmatprep.subr.bf16.mxu1 %v5126_v15 }
 0x29b   : > { %3125 = vmatpush1.bf16.msra.mxu0 %v5121_v56  ;;  %3289 = vmatpush1.bf16.msra.mxu1 %v5124_v19 }
 0x29c   : > { %3126 = vmatprep.subr.bf16.mxu0 %v5129_v20  ;;  %3290 = vmatprep.subr.bf16.mxu1 %v5132_v21 }
 0x29f   : > { %3127 = vmatpush1.bf16.msra.mxu0 %v5127_v22  ;;  %3291 = vmatpush1.bf16.msra.mxu1 %v5130_v23 }
 0x2a0   : > { %3705 = vmatprep.subr.bf16.mxu0 %v5135_v24  ;;  %4588 = vmatprep.subr.bf16.mxu1 %v5229_v36 }
 0x2a2   : > { %3129 = vmatmul.mubr.bf16.vlgmr.msra.gmra.mrb[4].mxu0 %v1413_v27  ;;  %3293 = vmatmul.mubr.bf16.vlgmr.msra.gmra.mrb[12].mxu1 %v1413_v27 }
 0x2a3   : > { %3706 = vmatpush1.bf16.msra.mxu0 %v5133_v26  ;;  %4589 = vmatpush3.bf16.msra.mxu1 %v5230_v60 }
 0x2a4   : > { %3707 = vmatprep.subr.bf16.mxu0 %v5138_v28  ;;  %4590 = vmatprep.subr.bf16.mxu1 %v5231_v61  ;;  %v5186_v28 = vld [vmem:[#allocation10 + $0x114] ss:$8 sps:$4 sm:$0xff]   ;;  %v5237_v61 = vld [vmem:[#allocation11 + $0x60] sm:$0xff]  }
 0x2a7   : > { %3708 = vmatpush1.bf16.msra.mxu0 %v5136_v29  ;;  %4591 = vmatpush3.bf16.msra.mxu1 %v5232_v62  ;;  %v5238_v62 = vld [vmem:[#allocation11 + $0x20] sm:$0xff]  }
 0x2a8   : > { %3709 = vmatprep.subr.bf16.mxu0 %v5141_v30  ;;  %4592 = vmatprep.subr.bf16.mxu1 %v5233_v63  ;;  %v5184_v30 = vld [vmem:[#allocation10 + $0x110] ss:$8 sps:$4 sm:$0xff]   ;;  %v5239_v63 = vld [vmem:[#allocation11 + $0x68] sm:$0xff]  }
 0x2ab   : > { %3710 = vmatpush1.bf16.msra.mxu0 %v5139_v31  ;;  %4593 = vmatpush3.bf16.msra.mxu1 %v5234_v0  ;;  %v5189_v31 = vld [vmem:[#allocation10 + $0x124] ss:$8 sps:$4 sm:$0xff]  }
 0x2ac   : > { %3711 = vmatprep.subr.bf16.mxu0 %v5144_v32  ;;  %4594 = vmatprep.subr.bf16.mxu1 %v5235_v1  ;;  %v5187_v32 = vld [vmem:[#allocation10 + $0x120] ss:$8 sps:$4 sm:$0xff]   ;;  %v5241_v1 = vld [vmem:[#allocation11 + $0x70] sm:$0xff]  }
 0x2ad   : > { %v5240_v0 = vld [vmem:[#allocation11 + $0x28] sm:$0xff]  }
 0x2af   : > { %3712 = vmatpush1.bf16.msra.mxu0 %v5142_v33  ;;  %4595 = vmatpush3.bf16.msra.mxu1 %v5236_v2  ;;  %v5192_v33 = vld [vmem:[#allocation10 + $0x134] ss:$8 sps:$4 sm:$0xff]  }
 0x2b0   : > { %3713 = vmatprep.subr.bf16.mxu0 %v5147_v34  ;;  %v5190_v34 = vld [vmem:[#allocation10 + $0x130] ss:$8 sps:$4 sm:$0xff]   ;;  %4596 = vmatprep.subr.bf16.mxu1 %v5237_v61 }
 0x2b1   : > { %v5242_v2 = vld [vmem:[#allocation11 + $0x30] sm:$0xff]  }
 0x2b3   : > { %3714 = vmatpush1.bf16.msra.mxu0 %v5145_v35  ;;  %v5195_v35 = vld [vmem:[#allocation10 + $0x144] ss:$8 sps:$4 sm:$0xff]   ;;  %4597 = vmatpush3.bf16.msra.mxu1 %v5238_v62 }
 0x2b4   : > { %3715 = vmatprep.subr.bf16.mxu0 %v5150_v37  ;;  %v5193_v37 = vld [vmem:[#allocation10 + $0x140] ss:$8 sps:$4 sm:$0xff]   ;;  %4598 = vmatprep.subr.bf16.mxu1 %v5239_v63 }
 0x2b7   : > { %3716 = vmatpush1.bf16.msra.mxu0 %v5148_v38  ;;  %v5198_v38 = vld [vmem:[#allocation10 + $0x154] ss:$8 sps:$4 sm:$0xff]   ;;  %4599 = vmatpush3.bf16.msra.mxu1 %v5240_v0 }
 0x2b8   : > { %3717 = vmatprep.subr.bf16.mxu0 %v5153_v39  ;;  %v5196_v39 = vld [vmem:[#allocation10 + $0x150] ss:$8 sps:$4 sm:$0xff]   ;;  %4600 = vmatprep.subr.bf16.mxu1 %v5241_v1 }
 0x2bb   : > { %3718 = vmatpush1.bf16.msra.mxu0 %v5151_v40  ;;  %v5201_v40 = vld [vmem:[#allocation10 + $0x164] ss:$8 sps:$4 sm:$0xff]   ;;  %4601 = vmatpush3.bf16.msra.mxu1 %v5242_v2 }
 0x2bc   : > { %3719 = vmatprep.subr.bf16.mxu0 %v5156_v41  ;;  %v5199_v41 = vld [vmem:[#allocation10 + $0x160] ss:$8 sps:$4 sm:$0xff]  }
 0x2bf   : > { %3720 = vmatpush1.bf16.msra.mxu0 %v5154_v42  ;;  %v5204_v42 = vld [vmem:[#allocation10 + $0x174] ss:$8 sps:$4 sm:$0xff]  }
 0x2c0   : > { %3721 = vmatprep.subr.bf16.mxu0 %v5159_v43  ;;  %v5202_v43 = vld [vmem:[#allocation10 + $0x170] ss:$8 sps:$4 sm:$0xff]  }
 0x2c3   : > { %3722 = vmatpush1.bf16.msra.mxu0 %v5157_v44  ;;  %v5207_v44 = vld [vmem:[#allocation10 + $0x184] ss:$8 sps:$4 sm:$0xff]  }
 0x2c4   : > { %3723 = vmatprep.subr.bf16.mxu0 %v5162_v45  ;;  %v5205_v45 = vld [vmem:[#allocation10 + $0x180] ss:$8 sps:$4 sm:$0xff]  }
 0x2c7   : > { %3724 = vmatpush1.bf16.msra.mxu0 %v5160_v46  ;;  %v5210_v46 = vld [vmem:[#allocation10 + $0x194] ss:$8 sps:$4 sm:$0xff]  }
 0x2c8   : > { %3725 = vmatprep.subr.bf16.mxu0 %v5165_v47  ;;  %v5208_v47 = vld [vmem:[#allocation10 + $0x190] ss:$8 sps:$4 sm:$0xff]  }
 0x2cb   : > { %3726 = vmatpush1.bf16.msra.mxu0 %v5163_v48  ;;  %v5213_v48 = vld [vmem:[#allocation10 + $0x1a4] ss:$8 sps:$4 sm:$0xff]  }
 0x2cc   : > { %3727 = vmatprep.subr.bf16.mxu0 %v5168_v49  ;;  %v5211_v49 = vld [vmem:[#allocation10 + $0x1a0] ss:$8 sps:$4 sm:$0xff]  }
 0x2cf   : > { %3728 = vmatpush1.bf16.msra.mxu0 %v5166_v50  ;;  %v5216_v50 = vld [vmem:[#allocation10 + $0x1b4] ss:$8 sps:$4 sm:$0xff]  }
 0x2d0   : > { %3729 = vmatprep.subr.bf16.mxu0 %v5171_v51  ;;  %v1684_v51 = vrot.slane %v5889_v3, %v565_v16  ;;  %v5226_v16 = vld [vmem:[#allocation10 + $0x1f0] ss:$8 sps:$4 sm:$0xff]  }
 0x2d1   : > { %v5243_v3 = vld [vmem:[#allocation11 + $0x78] sm:$0xff]  }
 0x2d2   : > { %4602 = vmatprep.subr.bf16.mxu1 %v5243_v3 }
 0x2d3   : > { %3730 = vmatpush1.bf16.msra.mxu0 %v5169_v52  ;;  %v5214_v52 = vld [vmem:[#allocation10 + $0x1b0] ss:$8 sps:$4 sm:$0xff]  }
 0x2d4   : > { %3731 = vmatprep.subr.bf16.mxu0 %v5174_v53  ;;  %v5219_v53 = vld [vmem:[#allocation10 + $0x1c4] ss:$8 sps:$4 sm:$0xff]  }
 0x2d7   : > { %3732 = vmatpush1.bf16.msra.mxu0 %v5172_v55 }
 0x2d8   : > { %3733 = vmatprep.subr.bf16.mxu0 %v5177_v54  ;;  %v5217_v54 = vld [vmem:[#allocation10 + $0x1c0] ss:$8 sps:$4 sm:$0xff]  }
 0x2db   : > { %3734 = vmatpush1.bf16.msra.mxu0 %v5175_v18  ;;  %v5222_v18 = vld [vmem:[#allocation10 + $0x1d4] ss:$8 sps:$4 sm:$0xff]  }
 0x2dc   : > { %3735 = vmatprep.subr.bf16.mxu0 %v5180_v57  ;;  %v5220_v57 = vld [vmem:[#allocation10 + $0x1d0] ss:$8 sps:$4 sm:$0xff]  }
 0x2df   : > { %3736 = vmatpush1.bf16.msra.mxu0 %v5178_v58  ;;  %v5225_v58 = vld [vmem:[#allocation10 + $0x1e4] ss:$8 sps:$4 sm:$0xff]  }
 0x2e0   : > { %3746 = vmatprep.subr.bf16.mxu0 %v5183_v59  ;;  %v5223_v59 = vld [vmem:[#allocation10 + $0x1e0] ss:$8 sps:$4 sm:$0xff]  }
 0x375   : > { %v3130_v7 = vpop.f32.mrb[4].mxu0  ;;  %v5898_v8 = vpop.f32.mrb[12].mxu1 }
 0x376   : > { %v4610_v13 = vadd.f32 %v3130_v7, %v1676_v4  ;;  %v3132_v9 = vpop.f32.mrb[5].mxu0  ;;  %v3296_v10 = vpop.f32.mrb[13].mxu1  ;;  %v4612_v55 = vadd.f32 %v5898_v8, %v1684_v51  ;;  %v5244_v4 = vld [vmem:[#allocation11 + $0x38] sm:$0xff]  }
 0x377   : > { %v4611_v15 = vadd.f32 %v3132_v9, %v1680_v5  ;;  %v4613_v56 = vadd.f32 %v3296_v10, %v1688_v6  ;;  %v3134_v19 = vpop.f32.mrb[6].mxu0  ;;  %v3298_v20 = vpop.f32.mrb[14].mxu1  ;;  %4603 = vmatpush3.bf16.msra.mxu1 %v5244_v4  ;;  %v3373_v5 = vld [vmem:[%s5966_s6] sm:$0x3] }
 0x378   : > { %v3135_v21 = vpop.f32.mrb[7].mxu0  ;;  %v3299_v22 = vpop.f32.mrb[15].mxu1  ;;  %5261 = vtanh.f32 %v4610_v13  ;;  %v3378_v6 = vrot.slane %v3373_v5, %v5850_v12  ;;  %v3382_v7 = vrot.slane %v3373_v5, %v5855_v14  ;;  %v4566_v14 = vld [vmem:[%s5968_s8] ss:$0 sm:$0xff] }
 0x379   : > { %5263 = vtanh.f32 %v4611_v15 }
 0x37a   : > { %5265 = vtanh.f32 %v4613_v56 }
 0x37b   : > { %5267 = vtanh.f32 %v4612_v55 }
 0x382   : > { %v5262_v23 = vpop.eup %5261 }
 0x383   : > { %v5264_v24 = vpop.eup %5263  ;;  %v3305_v27 = vpack.c.bf16 %v5262_v23, %v5262_v23 }
 0x384   : > { %v5266_v25 = vpop.eup %5265  ;;  %v3306_v26 = vpack.c.bf16 %v5264_v24, %v5264_v24 }
 0x385   : > { %v3308_v29 = vpack.c.bf16 %v5266_v25, %v5266_v25  ;;  %v5268_v36 = vpop.eup %5267 }
 0x386   : > { %3737 = vmatprep.mubr.bf16.mxu0 %v3306_v26  ;;  %v3307_v60 = vpack.c.bf16 %v5268_v36, %v5268_v36 }
 0x387   : > { %3738 = vmatmul.mubr.bf16.vlgmr.msra.gmra.mrb[8].mxu0 %v3305_v27 }
 0x388   : > { %3747 = vmatpush1.bf16.msra.mxu0 %v5181_v17  ;;  %3778 = vmatprep.mubr.bf16.mxu0 %v3308_v29 }
 0x389   : > { %3748 = vmatprep.subr.bf16.mxu0 %v5186_v28 }
 0x38c   : > { %3749 = vmatpush1.bf16.msra.mxu0 %v5184_v30 }
 0x38d   : > { %3750 = vmatprep.subr.bf16.mxu0 %v5189_v31 }
 0x390   : > { %3751 = vmatpush1.bf16.msra.mxu0 %v5187_v32 }
 0x391   : > { %3752 = vmatprep.subr.bf16.mxu0 %v5192_v33 }
 0x394   : > { %3753 = vmatpush1.bf16.msra.mxu0 %v5190_v34 }
 0x395   : > { %3754 = vmatprep.subr.bf16.mxu0 %v5195_v35 }
 0x398   : > { %3755 = vmatpush1.bf16.msra.mxu0 %v5193_v37 }
 0x399   : > { %3756 = vmatprep.subr.bf16.mxu0 %v5198_v38 }
 0x39c   : > { %3757 = vmatpush1.bf16.msra.mxu0 %v5196_v39 }
 0x39d   : > { %3758 = vmatprep.subr.bf16.mxu0 %v5201_v40 }
 0x3a0   : > { %3759 = vmatpush1.bf16.msra.mxu0 %v5199_v41 }
 0x3a1   : > { %3760 = vmatprep.subr.bf16.mxu0 %v5204_v42 }
 0x3a4   : > { %3761 = vmatpush1.bf16.msra.mxu0 %v5202_v43 }
 0x3a5   : > { %3762 = vmatprep.subr.bf16.mxu0 %v5207_v44 }
 0x3a8   : > { %3763 = vmatpush1.bf16.msra.mxu0 %v5205_v45 }
 0x3a9   : > { %3764 = vmatprep.subr.bf16.mxu0 %v5210_v46 }
 0x3ac   : > { %3765 = vmatpush1.bf16.msra.mxu0 %v5208_v47 }
 0x3ad   : > { %3766 = vmatprep.subr.bf16.mxu0 %v5213_v48 }
 0x3b0   : > { %3767 = vmatpush1.bf16.msra.mxu0 %v5211_v49 }
 0x3b1   : > { %3768 = vmatprep.subr.bf16.mxu0 %v5216_v50 }
 0x3b4   : > { %3769 = vmatpush1.bf16.msra.mxu0 %v5214_v52 }
 0x3b5   : > { %3770 = vmatprep.subr.bf16.mxu0 %v5219_v53 }
 0x3b8   : > { %3771 = vmatpush1.bf16.msra.mxu0 %v5217_v54 }
 0x3b9   : > { %3772 = vmatprep.subr.bf16.mxu0 %v5222_v18 }
 0x3bc   : > { %3773 = vmatpush1.bf16.msra.mxu0 %v5220_v57 }
 0x3bd   : > { %3774 = vmatprep.subr.bf16.mxu0 %v5225_v58 }
 0x3c0   : > { %3775 = vmatpush1.bf16.msra.mxu0 %v5223_v59 }
 0x3c1   : > { %3776 = vmatprep.subr.bf16.mxu0 %v5228_v11 }
 0x3c4   : > { %3777 = vmatpush1.bf16.msra.mxu0 %v5226_v16 }
 0x3c7   : > { %3779 = vmatmul.mubr.bf16.vlgmr.msra.gmra.mrb[8].mxu0 %v3307_v60 }
 0x49a   : > { %v3780_v8 = vpop.f32.mrb[8].mxu0 }
 0x49b   : > { %v4614_v13 = vadd.f32 %v3780_v8, %v3378_v6  ;;  %v3782_v9 = vpop.f32.mrb[9].mxu0 }
 0x49c   : > { %v4615_v10 = vadd.f32 %v3782_v9, %v3382_v7  ;;  %v3784_v15 = vpop.f32.mrb[10].mxu0 }
 0x49d   : > { %5269 = vtanh.f32 %v4614_v13  ;;  %v3785_v56 = vpop.f32.mrb[11].mxu0 }
 0x49e   : > { %5271 = vtanh.f32 %v4615_v10 }
 0x4a7   : > { %v5270_v19 = vpop.eup %5269 }
 0x4a8   : > { %v5272_v20 = vpop.eup %5271  ;;  %v3789_v22 = vpack.c.bf16 %v5270_v19, %v5270_v19 }
 0x4a9   : > { %v3790_v21 = vpack.c.bf16 %v5272_v20, %v5272_v20 }
 0x4ab   : > { %3958 = vmatprep.mubr.bf16.mxu1 %v3790_v21 }
 0x4ac   : > { %3959 = vmatmul.mubr.bf16.vlgmr.msra.gmra.mrb[16].mxu1 %v3789_v22 }
 0x57f   : > { %v4604_v12 = vpop.f32.mrb[16].mxu1 }
 0x580   : > { %v4605_v23 = vpop.f32.mrb[17].mxu1 }
 0x581   : > { %v4606_v24 = vadd.f32 %v4605_v23, %v4604_v12  ;;  %v4607_v25 = vpop.f32.mrb[18].mxu1 }
 0x582   : > { %v4608_v26 = vpop.f32.mrb[19].mxu1 }
 0x583   : > { %v3961_v17 = vadd.f32 %v4606_v24, %v4566_v14 }
 0x585   : > { %3966 = vst [vmem:[%s419_s13] sm:$0xff] %v3961_v17 }
 0x586   : > { %5456 = shalt.err (!%p5453_p1)
}
 0x587   : > { %s5457_s24 = scalar_lea.hbm %s5917_s19, 128  ;;  %s5461_s13 = scalar_lea.hbm %s5990_s16, 512 }
 0x588   : > { %p5458_p5 = scmp.ne.s32.totalorder %s5917_s19, %s5457_s24  ;;  %p5462_p7 = scmp.lt.u32.totalorder %s5917_s19, %s5990_s16 }
 0x589   : > { %p5463_p0 = scmp.lt.u32.totalorder %s5461_s13, %s5457_s24  ;;  %p5465_p2 = scmp.lt.u32.totalorder %s5457_s24, %s5917_s19 }
 0x58a   : > { %p5459_p8 = pnand %p5458_p5, %p5991_p6 }
 0x58b   : > { %p5464_p4 = por %p5463_p0, %p5462_p7 }
 0x58c   : > { %p5460_p9 = pneg %p5459_p8 }
 0x58d   : > { %p5466_p10 = por %p5465_p2, %p5464_p4 }
 0x58f   : > { %p5467_p11 = pnand %p5466_p10, %p5460_p9 }
 0x591   : > { %5470 = shalt.err (!%p5467_p11)
}
 0x592   : > { %4666 = dma.vmem_to_hbm [thread:$0]  (%p5991_p6), %s5919_s20, 128, %s5917_s19, %s3968_s27  }
 0x593 PF: > { %p4703_p3 = scmp.ge.s32.totalorder %s5521_s12, 2  ;;  %s3993_s18 = sand.u32 1, %s5509_s30  }
 0x594   : > { %p5992_p12 = scmp.ne.s32.totalorder %s5981_s28, 0  ;;  %s3994_s15 = scalar_lea.sflag [#allocation4], %s3993_s18 }
 0x596   : > { %p4689_p13 = pnand %p4703_p3, %p5992_p12 }
 0x598   : > { %5504 = dma.done.wait (!%p4689_p13), %s3994_s15, 128  }
 0x599   : > { %5506 = vsyncadd (!%p4689_p13), %s3994_s15, 4294967168  ;;  %p25_p1 = scmp.ge.s32.totalorder %s5741_s9, 6   ;;  %s5993_s30 = smov %s5513_s10 }
 0x59a   : > { %s5994_s10 = smov %s5517_s11  ;;  %s5995_s11 = smov %s5753_s25 }
 0x59b   : > { %s5996_s12 = smov %s5741_s9  ;;  %27 = sbr.rel (!%p25_p1) target bundleno = 10 (0xa), region = 121 }
 0x5a2   :  { %3999 = vsyncpa [#allocation3], 1 }
 0x5a3   :  { %4001 = vsyncpa [#allocation3 + $0x1], 1 }
 0x5a4   :  { %4002 = vsyncpa [#allocation6], 1 }
 0x5a5   :  { %4003 = vsyncpa [#allocation9], 1 }
 0x5a6   :  { %4004 = vsyncpa [#allocation12], 1 }
 0x5a7   :  { %4005 = vsyncpa [#allocation4], 1 }
 0x5a8   :  { %4007 = vsyncpa [#allocation4 + $0x1], 1 }

</bundles_post_ra>
